<compile_context>
chip_gen: v7x
topology: tpu7x:2x2x1
jax: 0.10.0
libtpu: 0.0.40
codegen_flags: <defaults>
</compile_context>

<pallas_src>
import jax
import jax.numpy as jnp
from jax.experimental import pallas as pl
from jax.experimental.pallas import tpu as pltpu

_LANE = 128


def _aclip_classify_kernel(x_ref, wenc_ref, wcls_ref, bcls_ref, o_ref, acc_ref):
    # x_ref:    [B, TK]      bf16 chunk of the flattened image
    # wenc_ref: [TK, D]      bf16 chunk of the stub encoder weight (streamed)
    # wcls_ref: [D, NCpad]   f32 classifier weight with mask pre-folded in
    # bcls_ref: [1, NCpad]   f32 classifier bias (zero-padded)
    # o_ref:    [B, NCpad]   f32 logits (lane-dense, padded)
    # acc_ref:  [B, D]       f32 feature accumulator (persists across K steps)
    k = pl.program_id(0)

    @pl.when(k == 0)
    def _():
        acc_ref[...] = jnp.zeros_like(acc_ref)

    # bf16 operands, f32 accumulation on the MXU.
    acc_ref[...] += jnp.dot(x_ref[...], wenc_ref[...],
                            preferred_element_type=jnp.float32)

    @pl.when(k == pl.num_programs(0) - 1)
    def _():
        # Mask was folded into wcls in the wrapper, so this GEMM directly
        # produces the masked logits.
        logits = jnp.dot(acc_ref[...], wcls_ref[...],
                         preferred_element_type=jnp.float32)
        o_ref[...] = logits + bcls_ref[...]


def aclip_classify(x_nchw, w_enc, mask, w_cls, b_cls, *, tk=512):
    """Forward pass of MyACLIP (with a stub linear encode_image).

    x_nchw: [B, C, H, W] f32       image
    w_enc:  [C*H*W, D]   f32       deterministic stub encoder projection
    mask:   [D]          f32       binary feature mask (0/1)
    w_cls:  [NC, D]      f32       classifier weight (PyTorch nn.Linear layout)
    b_cls:  [NC]         f32       classifier bias
    returns [B, NC] f32 logits
    """
    B = x_nchw.shape[0]
    F = x_nchw.shape[1] * x_nchw.shape[2] * x_nchw.shape[3]
    D = w_enc.shape[1]
    NC = w_cls.shape[0]
    nc_pad = max(_LANE, ((NC + _LANE - 1) // _LANE) * _LANE)

    # K-tile: must be a multiple of 128 and divide F; otherwise single step.
    if tk % _LANE != 0 or F % tk != 0:
        tk = F
    n_k = F // tk

    # bf16 for the bandwidth-dominant streamed operands.
    x_flat = x_nchw.reshape(B, F).astype(jnp.bfloat16)
    w_enc_bf16 = w_enc.astype(jnp.bfloat16)

    # Fold the binary mask into the classifier weight and pad NC -> lane-dense.
    w_cls_t = (mask.reshape(D, 1) * w_cls.T).astype(jnp.float32)       # [D, NC]
    w_cls_t = jnp.pad(w_cls_t, ((0, 0), (0, nc_pad - NC)))             # [D, NCpad]
    b_row = jnp.pad(b_cls.astype(jnp.float32), (0, nc_pad - NC)).reshape(1, nc_pad)

    cost = pl.CostEstimate(
        flops=2 * B * F * D + 2 * B * D * nc_pad,
        transcendentals=0,
        bytes_accessed=(x_flat.size * 2 + w_enc_bf16.size * 2
                        + w_cls_t.size * 4 + b_row.size * 4 + B * nc_pad * 4),
    )

    out = pl.pallas_call(
        _aclip_classify_kernel,
        out_shape=jax.ShapeDtypeStruct((B, nc_pad), jnp.float32),
        grid_spec=pltpu.PrefetchScalarGridSpec(
            num_scalar_prefetch=0,
            grid=(n_k,),
            in_specs=[
                pl.BlockSpec((B, tk), lambda k: (0, k)),       # x chunk
                pl.BlockSpec((tk, D), lambda k: (k, 0)),       # W_enc chunk (streamed)
                pl.BlockSpec((D, nc_pad), lambda k: (0, 0)),   # masked classifier (resident)
                pl.BlockSpec((1, nc_pad), lambda k: (0, 0)),   # bias (resident)
            ],
            out_specs=pl.BlockSpec((B, nc_pad), lambda k: (0, 0)),
            scratch_shapes=[pltpu.VMEM((B, D), jnp.float32)],
        ),
        compiler_params=pltpu.CompilerParams(
            dimension_semantics=("arbitrary",),   # reduction axis
        ),
        cost_estimate=cost,
    )(x_flat, w_enc_bf16, w_cls_t, b_row)

    return out[:, :NC]


if __name__ == "__main__":
    key = jax.random.PRNGKey(0)
    k_x, k_enc, k_mask, k_w, k_b = jax.random.split(key, 5)

    B, C, H, W = 2, 4, 16, 16
    F = C * H * W            # 1024
    D = 768                  # matches nn.Linear(768, num_classes)
    NUM_CLASSES = 8

    x = jax.random.normal(k_x, (B, C, H, W), dtype=jnp.float32)

    # TODO(synk): the real model.encode_image (full CLIP ViT tower driven by
    # the attention-derived token mask from get_mask/get_att_mask) is an
    # external module; it is replaced here by a deterministic linear stub
    # projection plus a static binary feature mask.
    w_enc = jax.random.normal(k_enc, (F, D), dtype=jnp.float32) * 0.02
    mask = (jax.random.uniform(k_mask, (D,)) < 0.5).astype(jnp.float32)
    w_cls = jax.random.normal(k_w, (NUM_CLASSES, D), dtype=jnp.float32) * 0.05
    b_cls = jax.random.normal(k_b, (NUM_CLASSES,), dtype=jnp.float32) * 0.01

    logits = aclip_classify(x, w_enc, mask, w_cls, b_cls, tk=512)
    jax.block_until_ready(logits)

    # Reference in plain JAX with matched bf16 operands (f32 accumulation).
    feats_ref = jnp.dot(x.reshape(B, F).astype(jnp.bfloat16),
                        w_enc.astype(jnp.bfloat16),
                        preferred_element_type=jnp.float32)
    ref = (mask * feats_ref) @ w_cls.T + b_cls

    assert logits.shape == (B, NUM_CLASSES)
    assert jnp.allclose(logits, ref, atol=1e-2, rtol=1e-2), "mismatch vs reference"

    print("KERNEL_OK")
</pallas_src>

<mosaic_0001>
module attributes {stable_mosaic.version = 11 : i64} {
  func.func @_aclip_classify_kernel(%arg0: i32, %arg1: memref<2x512xbf16, #tpu.memory_space<vmem>>, %arg2: memref<512x768xbf16, #tpu.memory_space<vmem>>, %arg3: memref<768x128xf32, #tpu.memory_space<vmem>>, %arg4: memref<1x128xf32, #tpu.memory_space<vmem>>, %arg5: memref<2x128xf32, #tpu.memory_space<vmem>>, %arg6: memref<2x768xf32, #tpu.memory_space<vmem>>) attributes {dimension_semantics = [#tpu.dimension_semantics<arbitrary>], iteration_bounds = array<i64: 2>, scalar_prefetch = 0 : i64, scratch_operands = 1 : i64, tpu.core_type = #tpu.core_type<tc>, window_params = [{transform_indices = @transform_0, window_bounds = array<i64: 2, 512>}, {transform_indices = @transform_1, window_bounds = array<i64: 512, 768>}, {pipeline_mode = #tpu.pipeline_mode<synchronous>, transform_indices = @transform_2, window_bounds = array<i64: 768, 128>}, {pipeline_mode = #tpu.pipeline_mode<synchronous>, transform_indices = @transform_3, window_bounds = array<i64: 1, 128>}, {pipeline_mode = #tpu.pipeline_mode<synchronous>, transform_indices = @transform_4, window_bounds = array<i64: 2, 128>}]} {
    %c0_i32 = arith.constant 0 : i32
    %0 = arith.cmpi eq, %arg0, %c0_i32 : i32
    %1 = arith.extui %0 : i1 to i32
    %c0_i32_0 = arith.constant 0 : i32
    %2 = arith.cmpi ne, %1, %c0_i32_0 : i32
    scf.if %2 {
      %cst_9 = arith.constant 0.000000e+00 : f32
      %12 = vector.broadcast %cst_9 : f32 to vector<2x768xf32>
      %c0_10 = arith.constant 0 : index
      %c0_11 = arith.constant 0 : index
      %13 = vector.load %arg6[%c0_10, %c0_11] : memref<2x768xf32, #tpu.memory_space<vmem>>, vector<2x768xf32>
      tpu.vector_store %arg6[%c0_10, %c0_11], %12 {strides = array<i32>} : memref<2x768xf32, #tpu.memory_space<vmem>>, vector<2x768xf32>,
    } else {
    }
    %c0 = arith.constant 0 : index
    %c0_1 = arith.constant 0 : index
    %3 = vector.load %arg6[%c0, %c0_1] : memref<2x768xf32, #tpu.memory_space<vmem>>, vector<2x768xf32>
    %c0_2 = arith.constant 0 : index
    %c0_3 = arith.constant 0 : index
    %4 = vector.load %arg1[%c0_2, %c0_3] : memref<2x512xbf16, #tpu.memory_space<vmem>>, vector<2x512xbf16>
    %c0_4 = arith.constant 0 : index
    %c0_5 = arith.constant 0 : index
    %5 = vector.load %arg2[%c0_4, %c0_5] : memref<512x768xbf16, #tpu.memory_space<vmem>>, vector<512x768xbf16>
    %cst = arith.constant dense<0.000000e+00> : vector<2x768xf32>
    %6 = tpu.matmul %4, %5, %cst {dimension_numbers = #tpu.dot_dimension_numbers<[1], [0], [0], [1], [0, 0, 1, 1], [], []>} : vector<2x512xbf16>, vector<512x768xbf16>, vector<2x768xf32> -> vector<2x768xf32>
    %7 = arith.addf %3, %6 : vector<2x768xf32>
    %c0_6 = arith.constant 0 : index
    %c0_7 = arith.constant 0 : index
    %8 = vector.load %arg6[%c0_6, %c0_7] : memref<2x768xf32, #tpu.memory_space<vmem>>, vector<2x768xf32>
    tpu.vector_store %arg6[%c0_6, %c0_7], %7 {strides = array<i32>} : memref<2x768xf32, #tpu.memory_space<vmem>>, vector<2x768xf32>,
    %c1_i32 = arith.constant 1 : i32
    %9 = arith.cmpi eq, %arg0, %c1_i32 : i32
    %10 = arith.extui %9 : i1 to i32
    %c0_i32_8 = arith.constant 0 : i32
    %11 = arith.cmpi ne, %10, %c0_i32_8 : i32
    scf.if %11 {
      %c0_9 = arith.constant 0 : index
      %c0_10 = arith.constant 0 : index
      %12 = vector.load %arg6[%c0_9, %c0_10] : memref<2x768xf32, #tpu.memory_space<vmem>>, vector<2x768xf32>
      %c0_11 = arith.constant 0 : index
      %c0_12 = arith.constant 0 : index
      %13 = vector.load %arg3[%c0_11, %c0_12] : memref<768x128xf32, #tpu.memory_space<vmem>>, vector<768x128xf32>
      %cst_13 = arith.constant dense<0.000000e+00> : vector<2x128xf32>
      %14 = tpu.matmul %12, %13, %cst_13 {dimension_numbers = #tpu.dot_dimension_numbers<[1], [0], [0], [1], [0, 0, 1, 1], [], []>} : vector<2x768xf32>, vector<768x128xf32>, vector<2x128xf32> -> vector<2x128xf32>
      %c0_14 = arith.constant 0 : index
      %c0_15 = arith.constant 0 : index
      %15 = vector.load %arg4[%c0_14, %c0_15] : memref<1x128xf32, #tpu.memory_space<vmem>>, vector<1x128xf32>
      %16 = vector.broadcast %15 : vector<1x128xf32> to vector<2x128xf32>
      %17 = arith.addf %14, %16 : vector<2x128xf32>
      %c0_16 = arith.constant 0 : index
      %c0_17 = arith.constant 0 : index
      %18 = vector.load %arg5[%c0_16, %c0_17] : memref<2x128xf32, #tpu.memory_space<vmem>>, vector<2x128xf32>
      tpu.vector_store %arg5[%c0_16, %c0_17], %17 {strides = array<i32>} : memref<2x128xf32, #tpu.memory_space<vmem>>, vector<2x128xf32>,
    } else {
    }
    return
  }
  func.func @transform_0(%arg0: i32) -> (i32, i32) {
    %c0_i32 = arith.constant 0 : i32
    %c0_i32_0 = arith.constant 0 : i32
    return %c0_i32, %arg0 : i32, i32
  }
  func.func @transform_1(%arg0: i32) -> (i32, i32) {
    %c0_i32 = arith.constant 0 : i32
    %c0_i32_0 = arith.constant 0 : i32
    return %arg0, %c0_i32 : i32, i32
  }
  func.func @transform_2(%arg0: i32) -> (i32, i32) {
    %c0_i32 = arith.constant 0 : i32
    %c0_i32_0 = arith.constant 0 : i32
    %c0_i32_1 = arith.constant 0 : i32
    return %c0_i32, %c0_i32_0 : i32, i32
  }
  func.func @transform_3(%arg0: i32) -> (i32, i32) {
    %c0_i32 = arith.constant 0 : i32
    %c0_i32_0 = arith.constant 0 : i32
    %c0_i32_1 = arith.constant 0 : i32
    return %c0_i32, %c0_i32_0 : i32, i32
  }
  func.func @transform_4(%arg0: i32) -> (i32, i32) {
    %c0_i32 = arith.constant 0 : i32
    %c0_i32_0 = arith.constant 0 : i32
    %c0_i32_1 = arith.constant 0 : i32
    return %c0_i32, %c0_i32_0 : i32, i32
  }
}

</mosaic_0001>

<bundles_post_ra>
// kernel: tpu_custom_call.1
= control target key start
LH: loop header
LB: loop body
LE: loop exit
PB: predicated region body
PF: predicated region fallthrough
CT: control target
= control target key end

     0   :  { %9 = vsyncpa [#allocation4], 0  ;;  %s3700_s0 = inlined_call_operand.hbm [shape: bf16[2,1024], index: 0, kind: input, shape index: {}]   ;;  %s3701_s1 = inlined_call_operand.hbm [shape: bf16[1024,768], index: 1, kind: input, shape index: {}]   ;;  %s3702_s2 = inlined_call_operand.hbm [shape: f32[768,128], index: 2, kind: input, shape index: {}]   ;;  %s3703_s3 = inlined_call_operand.hbm [shape: f32[1,128], index: 3, kind: input, shape index: {}]   ;;  %s3704_s4 = inlined_call_operand.hbm [shape: f32[2,128], index: 4, kind: output, shape index: {}]  }
   0x1   :  { %11 = vsyncpa [#allocation4 + $0x1], 0 }
   0x2   :  { %12 = vsyncpa [#allocation7], 0 }
   0x3   :  { %14 = vsyncpa [#allocation7 + $0x1], 0 }
   0x4   :  { %15 = vsyncpa [#allocation10], 0 }
   0x5   :  { %16 = vsyncpa [#allocation5], 0  ;;  %s3227_s15 = smov 0   ;;  %s3229_s16 = smov 0  }
   0x6   :  { %s3231_s17 = smov 0   ;;  %s3233_s18 = smov 0  }
   0x7 LB: > { %s3246_s19 = sadd.s32 4294967295, %s3188_s18   ;;  %p42_p0 = scmp.ne.s32.totalorder %s3180_s16, %s3176_s15  ;;  %s3188_s18 = sphi %s3233_s18, %s3722_s18   ;;  %s3184_s17 = sphi %s3231_s17, %s3721_s17   ;;  %s3180_s16 = sphi %s3229_s16, %s3720_s16   ;;  %s3176_s15 = sphi %s3227_s15, %s3719_s15  }
   0x8   : > { %p3705_p1 = scmp.eq.s32.totalorder %s3246_s19, 0  ;;  %p2198_p2 = scmp.ge.s32.totalorder %s3188_s18, 1 }
   0x9   : > { %p142_p3 = scmp.lt.s32.totalorder %s3188_s18, 3  ;;  %s3190_s22 = smov [#allocation8]  }
   0xa   : > { %p3255_p5 = por %p3705_p1, %p42_p0  ;;  %s154_s23 = sshll.u32 %s3190_s22, 4  ;;  %s155_s23 = int_to_ptr.vmem [resolvable:$true] %s154_s23 }
   0xb   : > { %p3259_p6 = pnand %p2198_p2, %p142_p3  ;;  %s3191_s25 = smov [#allocation9]  }
   0xc   : > { %s3708_s20 = scalar_select %p3255_p5, 1, 0 }
   0xd   : > { %s3709_s21 = scalar_select %p3259_p6, 1, 0 }
   0xe   : > { %p2644_p7 = pneg %p3259_p6  ;;  %s168_s26 = sshll.u32 %s3191_s25, 4  ;;  %s3271_s26 = int_to_ptr.vmem [resolvable:$true] %s168_s26 }
   0xf   : > { %s2996_s29 = scalar_lea.hbm %s3702_s2, 12288 }
  0x10   : > { %p3267_p8 = pnand %p2644_p7, %p3705_p1  ;;  %p2997_p9 = scmp.ne.s32.totalorder %s3702_s2, %s2996_s29 }
  0x11   : > { %p3003_p13 = scmp.lt.u32.totalorder %s2996_s29, %s3702_s2 }
  0x12   : > { %p2998_p10 = pneg %p3267_p8 }
  0x14   : > { %p2999_p11 = pnand %p2998_p10, %p2997_p9 }
  0x16   : > { %p3000_p12 = pneg %p2999_p11 }
  0x18   : > { %p3005_p0 = pnand %p3003_p13, %p3000_p12 }
  0x1a   : > { %3008 = shalt.err (!%p3005_p0)
}
  0x1b   : > { %s3009_s8 = scalar_lea.vmem %s155_s23, 12288  ;;  %p3017_p4 = scmp.lt.s32.totalorder %s155_s23, %s155_s23 }
  0x1c   : > { %p3010_p2 = scmp.ne.s32.totalorder %s155_s23, %s3009_s8  ;;  %p3018_p1 = scmp.lt.s32.totalorder %s3009_s8, %s3009_s8 }
  0x1e   : > { %p3012_p3 = pnand %p3010_p2, %p2998_p10  ;;  %p3019_p5 = por %p3018_p1, %p3017_p4 }
  0x20   : > { %p3013_p7 = pneg %p3012_p3 }
  0x22   : > { %p3020_p6 = pnand %p3019_p5, %p3013_p7 }
  0x24   : > { %3023 = shalt.err (!%p3020_p6)
}
  0x25   : > { %s3192_s9 = smov 128   ;;  %s3193_s10 = smov 8  }
  0x26   : > { %2647 = dma.hbm_to_vmem [thread:$0]  (!%p3267_p8), %s3702_s2, 12288, %s155_s23, [#allocation7], %s3192_s9, %s3192_s9, %s3193_s10  }
  0x27   : > { %s3024_s15 = scalar_lea.hbm %s3703_s3, 16 }
  0x28   : > { %p3025_p9 = scmp.ne.s32.totalorder %s3703_s3, %s3024_s15  ;;  %p3031_p5 = scmp.lt.u32.totalorder %s3024_s15, %s3703_s3 }
  0x2a   : > { %p3027_p1 = pnand %p3025_p9, %p2998_p10 }
  0x2c   : > { %p3028_p4 = pneg %p3027_p1 }
  0x2e   : > { %p3033_p6 = pnand %p3031_p5, %p3028_p4 }
  0x30   : > { %3036 = shalt.err (!%p3033_p6)
}
  0x31   : > { %s3037_s23 = scalar_lea.vmem %s3271_s26, 16  ;;  %s3044_s29 = scalar_lea.vmem %s3271_s26, 32 }
  0x32   : > { %p3038_p11 = scmp.ne.s32.totalorder %s3271_s26, %s3037_s23  ;;  %p3045_p0 = scmp.lt.s32.totalorder %s3271_s26, %s3271_s26 }
  0x33   : > { %p3046_p2 = scmp.lt.s32.totalorder %s3044_s29, %s3037_s23 }
  0x34   : > { %p3040_p12 = pnand %p3038_p11, %p2998_p10 }
  0x35   : > { %p3047_p3 = por %p3046_p2, %p3045_p0 }
  0x36   : > { %p3041_p13 = pneg %p3040_p12 }
  0x38   : > { %p3048_p7 = pnand %p3047_p3, %p3041_p13 }
  0x3a   : > { %3051 = shalt.err (!%p3048_p7)
}
  0x3b   : > { %2650 = dma.hbm_to_vmem [thread:$0]  (!%p3267_p8), %s3703_s3, 16, %s3271_s26, [#allocation10]  }
  0x3c   : > { %s3322_s6 = sadd.s32 1, %s3188_s18   ;;  %s29_s7 = sadd.s32 1, %s3184_s17 }
  0x3d   : > { %s26_s24 = ssub.s32 %s3188_s18, %s3322_s6  ;;  %p36_p10 = scmp.ne.s32.totalorder %s3184_s17, %s3180_s16 }
  0x3e   : > { %p27_p9 = scmp.eq.s32.totalorder %s26_s24, 0  ;;  %p37_p1 = scmp.eq.s32.totalorder %s3188_s18, 0 }
  0x3f   : > { %p2660_p4 = scmp.lt.s32.totalorder %s3188_s18, 2  ;;  %s3332_s8 = sand.u32 1, %s3184_s17  }
  0x40   : > { %s3335_s9 = scalar_select %p27_p9, %s3184_s17, %s29_s7  }
  0x41   : > { %p38_p5 = por %p37_p1, %p36_p10  ;;  %s2202_s10 = sshll.u32 %s3332_s8, 2 }
  0x42   : > { %s2413_s26 = sshll.u32 %s3188_s18, 6  ;;  %s183_s14 = scalar_lea.vmem [#allocation3], %s2202_s10 }
  0x43   : > { %s3342_s13 = scalar_lea.hbm %s3700_s0, %s2413_s26  ;;  %s191_s15 = sshll.u32 %s183_s14, 4  ;;  %s3348_s15 = int_to_ptr.vmem [resolvable:$true] %s191_s15 }
  0x44   : > { %p3344_p8 = pnand %p2660_p4, %p38_p5  ;;  %s2625_s25 = smul.u32 1536, %s3332_s8 }
  0x45   : > { %s198_s27 = sand.u32 1, %s3188_s18   ;;  %s180_s28 = scalar_lea.sflag [#allocation4], %s3332_s8 }
  0x46   : > { %s3052_s23 = scalar_lea.hbm %s3342_s13, 64  ;;  %p3054_p11 = pneg %p3344_p8 }
  0x47   : > { %p3053_p6 = scmp.ne.s32.totalorder %s3342_s13, %s3052_s23  ;;  %s3057_s5 = scalar_lea.hbm %s3700_s0, 128 }
  0x48   : > { %p3058_p0 = scmp.lt.u32.totalorder %s3342_s13, %s3700_s0  ;;  %p3059_p2 = scmp.lt.u32.totalorder %s3057_s5, %s3052_s23 }
  0x49   : > { %p3055_p12 = pnand %p3054_p11, %p3053_p6  ;;  %p3061_p7 = scmp.lt.u32.totalorder %s3052_s23, %s3342_s13 }
  0x4a   : > { %p3060_p3 = por %p3059_p2, %p3058_p0 }
  0x4b   : > { %p3056_p13 = pneg %p3055_p12 }
  0x4c   : > { %p3062_p10 = por %p3061_p7, %p3060_p3 }
  0x4e   : > { %p3063_p9 = pnand %p3062_p10, %p3056_p13 }
  0x50   : > { %3066 = shalt.err (!%p3063_p9)
}
  0x51   : > { %s3067_s10 = scalar_lea.vmem %s3348_s15, 64  ;;  %s3194_s26 = smov [#allocation3]  }
  0x52   : > { %p3068_p1 = scmp.ne.s32.totalorder %s3348_s15, %s3067_s10  ;;  %s3072_s11 = sshll.u32 %s3194_s26, 4  ;;  %s3073_s11 = int_to_ptr.vmem [resolvable:$false] %s3072_s11 }
  0x53   : > { %s3074_s12 = scalar_lea.vmem %s3073_s11, 128  ;;  %p3075_p6 = scmp.lt.s32.totalorder %s3348_s15, %s3073_s11 }
  0x54   : > { %p3070_p4 = pnand %p3068_p1, %p3054_p11  ;;  %p3076_p12 = scmp.lt.s32.totalorder %s3074_s12, %s3067_s10 }
  0x56   : > { %p3071_p5 = pneg %p3070_p4  ;;  %p3077_p0 = por %p3076_p12, %p3075_p6 }
  0x58   : > { %p3078_p2 = pnand %p3077_p0, %p3071_p5 }
  0x5a   : > { %3081 = shalt.err (!%p3078_p2)
}
  0x5b   : > { %2654 = dma.hbm_to_vmem [thread:$0]  (!%p3344_p8), %s3342_s13, 64, %s3348_s15, %s180_s28  }
  0x5c   : > { %s202_s14 = scalar_lea.vmem [#allocation6], %s2625_s25  ;;  %s2626_s29 = smul.u32 24576, %s3188_s18 }
  0x5d   : > { %s210_s23 = sshll.u32 %s202_s14, 4  ;;  %s3390_s24 = scalar_lea.sflag [#allocation7], %s198_s27  ;;  %s3381_s23 = int_to_ptr.vmem [resolvable:$true] %s210_s23 }
  0x5e   : > { %s3386_s7 = scalar_lea.hbm %s3701_s1, %s2626_s29  ;;  %s3087_s15 = scalar_lea.hbm %s3701_s1, 49152 }
  0x5f   : > { %s3082_s10 = scalar_lea.hbm %s3386_s7, 24576  ;;  %p3088_p10 = scmp.lt.u32.totalorder %s3386_s7, %s3701_s1 }
  0x60   : > { %p3083_p13 = scmp.ne.s32.totalorder %s3386_s7, %s3082_s10  ;;  %p3089_p9 = scmp.lt.u32.totalorder %s3087_s15, %s3082_s10 }
  0x61   : > { %p3091_p4 = scmp.lt.u32.totalorder %s3082_s10, %s3386_s7 }
  0x62   : > { %p3085_p3 = pnand %p3083_p13, %p3054_p11  ;;  %p3090_p1 = por %p3089_p9, %p3088_p10 }
  0x64   : > { %p3086_p7 = pneg %p3085_p3  ;;  %p3092_p5 = por %p3091_p4, %p3090_p1 }
  0x66   : > { %p3093_p6 = pnand %p3092_p5, %p3086_p7 }
  0x68   : > { %3096 = shalt.err (!%p3093_p6)
}
  0x69   : > { %s3097_s18 = scalar_lea.vmem %s3381_s23, 24576  ;;  %s3195_s27 = smov [#allocation6]  }
  0x6a   : > { %p3098_p12 = scmp.ne.s32.totalorder %s3381_s23, %s3097_s18  ;;  %s3102_s26 = sshll.u32 %s3195_s27, 4  ;;  %s3103_s26 = int_to_ptr.vmem [resolvable:$false] %s3102_s26 }
  0x6b   : > { %s3104_s11 = scalar_lea.vmem %s3103_s26, 49152  ;;  %p3105_p13 = scmp.lt.s32.totalorder %s3381_s23, %s3103_s26 }
  0x6c   : > { %p3100_p0 = pnand %p3098_p12, %p3054_p11  ;;  %p3106_p3 = scmp.lt.s32.totalorder %s3104_s11, %s3097_s18 }
  0x6e   : > { %p3101_p2 = pneg %p3100_p0  ;;  %p3107_p10 = por %p3106_p3, %p3105_p13 }
  0x70   : > { %p3108_p9 = pnand %p3107_p10, %p3101_p2 }
  0x72   : > { %3111 = shalt.err (!%p3108_p9)
}
  0x73   : > { %s3196_s12 = smov 384   ;;  %s3197_s14 = smov 24  }
  0x74   : > { %2657 = dma.hbm_to_vmem [thread:$0]  (!%p3344_p8), %s3386_s7, 24576, %s3381_s23, %s3390_s24, %s3196_s12, %s3196_s12, %s3197_s14  }
  0x75   : > { %p3712_p11 = scmp.ne.s32.totalorder %s3709_s21, 0 }
  0x76   : > { %s224_s29 = sand.u32 (!%p3712_p11), 1, %s3180_s16   ;;  %p3713_p7 = scmp.ne.s32.totalorder (!%p3712_p11), %s3708_s20, 0 }
  0x77   : > { %222 = sbr.rel (%p3712_p11) target bundleno = 853 (0x355), region = 36  ;;  %s2209_s30 = sshll.u32 (!%p3712_p11), %s224_s29, 2 }
  0x78   : > { %s225_s5 = scalar_lea.sflag (!%p3712_p11), [#allocation4], %s224_s29  ;;  %s3419_s10 = scalar_lea.vmem (!%p3712_p11), [#allocation3], %s2209_s30 }
  0x7e   : > { %3155 = dma.done.wait (%p3713_p7), %s225_s5, 64  }
  0x7f   : > { %3157 = vsyncadd (%p3713_p7), %s225_s5, 4294967232  ;;  %s233_s8 = sand.u32 1, %s3246_s19   ;;  %s2627_s22 = smul.u32 1536, %s224_s29 }
  0x80   : > { %s234_s23 = scalar_lea.sflag [#allocation7], %s233_s8 }
  0x81   : > { %s3426_s7 = scalar_lea.vmem [#allocation6], %s2627_s22 }
  0x82   : > { %3159 = dma.done.wait (%p3713_p7), %s234_s23, 24576  }
  0x83   : > { %3161 = vsyncadd (%p3713_p7), %s234_s23, 4294942720  ;;  %p3714_p8 = scmp.eq.s32.totalorder %s3246_s19, 0 }
  0x85   : > { %3163 = dma.done.wait (%p3714_p8), [#allocation7], 12288   ;;  %p3715_p1 = pmov %p3714_p8 }
  0x87   : > { %3165 = vsyncadd (%p3715_p1), [#allocation7], 4294955008  ;;  %p3716_p4 = pmov %p3715_p1 }
  0x88   : > { %p3717_p5 = pmov %p3715_p1 }
  0x89   : > { %3167 = dma.done.wait (%p3716_p4), [#allocation10], 16  }
  0x8a   : > { %3169 = vsyncadd (%p3717_p5), [#allocation10], 4294967280  ;;  %p3718_p6 = scmp.ne.s32.totalorder %s3246_s19, 0 }
  0x8b   : > { %v3198_v0 = vmov (!%p3718_p6), 0.0  }
  0x8c   : > { %275 = sbr.rel (%p3718_p6) target bundleno = 147 (0x93), region = 56  ;;  %276 = vst [vmem:[#allocation2] sm:$0xff] (!%p3718_p6), %v3198_v0  ;;  %277 = vst [vmem:[#allocation2 + $0x8] sm:$0xf] (!%p3718_p6), %v3198_v0 }
  0x93 PF: > { %v2707_v1 = vld [vmem:[%s3426_s7 + $0x4] ss:$24 sps:$4 sm:$0xff]   ;;  %v2711_v3 = vld [vmem:[%s3426_s7] ss:$24 sps:$4 sm:$0xff]   ;;  %v2713_v5 = vld [vmem:[%s3426_s7 + $0x34] ss:$24 sps:$4 sm:$0xff]   ;;  %v485_v41 = vlaneseq }
  0x94   : > { %v2709_v2 = vld [vmem:[%s3426_s7 + $0x304] ss:$24 sps:$4 sm:$0xff]   ;;  %1462 = vmatprep.subr.bf16.mxu1 %v2707_v1  ;;  %v2712_v4 = vld [vmem:[%s3426_s7 + $0x300] ss:$24 sps:$4 sm:$0xff]   ;;  %v2715_v6 = vld [vmem:[%s3426_s7 + $0x334] ss:$24 sps:$4 sm:$0xff]  }
  0x95   : > { %1503 = vmatprep.subr.bf16.mxu0 %v2709_v2  ;;  %1463 = vmatpush1.bf16.msra.mxu1 %v2711_v3  ;;  %v2717_v7 = vld [vmem:[%s3426_s7 + $0x30] ss:$24 sps:$4 sm:$0xff]   ;;  %v2719_v9 = vld [vmem:[%s3426_s7 + $0x64] ss:$24 sps:$4 sm:$0xff]   ;;  %v2723_v11 = vld [vmem:[%s3426_s7 + $0x60] ss:$24 sps:$4 sm:$0xff]  }
  0x96   : > { %1504 = vmatpush1.bf16.msra.mxu0 %v2712_v4  ;;  %1464 = vmatprep.subr.bf16.mxu1 %v2713_v5  ;;  %v2718_v8 = vld [vmem:[%s3426_s7 + $0x330] ss:$24 sps:$4 sm:$0xff]   ;;  %v2721_v10 = vld [vmem:[%s3426_s7 + $0x364] ss:$24 sps:$4 sm:$0xff]   ;;  %v2724_v12 = vld [vmem:[%s3426_s7 + $0x360] ss:$24 sps:$4 sm:$0xff]  }
  0x97   : > { %1505 = vmatprep.subr.bf16.mxu0 %v2715_v6  ;;  %v2725_v13 = vld [vmem:[%s3426_s7 + $0x94] ss:$24 sps:$4 sm:$0xff]   ;;  %v2729_v15 = vld [vmem:[%s3426_s7 + $0x90] ss:$24 sps:$4 sm:$0xff]   ;;  %v2731_v17 = vld [vmem:[%s3426_s7 + $0xc4] ss:$24 sps:$4 sm:$0xff]  }
  0x98   : > { %v2727_v14 = vld [vmem:[%s3426_s7 + $0x394] ss:$24 sps:$4 sm:$0xff]   ;;  %v2730_v16 = vld [vmem:[%s3426_s7 + $0x390] ss:$24 sps:$4 sm:$0xff]   ;;  %v2733_v18 = vld [vmem:[%s3426_s7 + $0x3c4] ss:$24 sps:$4 sm:$0xff]  }
  0x99   : > { %1465 = vmatpush1.bf16.msra.mxu1 %v2717_v7  ;;  %v2735_v19 = vld [vmem:[%s3426_s7 + $0xc0] ss:$24 sps:$4 sm:$0xff]   ;;  %v2737_v21 = vld [vmem:[%s3426_s7 + $0xf4] ss:$24 sps:$4 sm:$0xff]   ;;  %v2741_v23 = vld [vmem:[%s3426_s7 + $0xf0] ss:$24 sps:$4 sm:$0xff]  }
  0x9a   : > { %1506 = vmatpush1.bf16.msra.mxu0 %v2718_v8  ;;  %1466 = vmatprep.subr.bf16.mxu1 %v2719_v9  ;;  %v2736_v20 = vld [vmem:[%s3426_s7 + $0x3c0] ss:$24 sps:$4 sm:$0xff]   ;;  %v2739_v22 = vld [vmem:[%s3426_s7 + $0x3f4] ss:$24 sps:$4 sm:$0xff]   ;;  %v2742_v24 = vld [vmem:[%s3426_s7 + $0x3f0] ss:$24 sps:$4 sm:$0xff]  }
  0x9b   : > { %1507 = vmatprep.subr.bf16.mxu0 %v2721_v10  ;;  %v2743_v25 = vld [vmem:[%s3426_s7 + $0x124] ss:$24 sps:$4 sm:$0xff]   ;;  %v2747_v27 = vld [vmem:[%s3426_s7 + $0x120] ss:$24 sps:$4 sm:$0xff]   ;;  %v2749_v29 = vld [vmem:[%s3426_s7 + $0x154] ss:$24 sps:$4 sm:$0xff]  }
  0x9c   : > { %v2745_v26 = vld [vmem:[%s3426_s7 + $0x424] ss:$24 sps:$4 sm:$0xff]   ;;  %v2748_v28 = vld [vmem:[%s3426_s7 + $0x420] ss:$24 sps:$4 sm:$0xff]   ;;  %v2751_v30 = vld [vmem:[%s3426_s7 + $0x454] ss:$24 sps:$4 sm:$0xff]  }
  0x9d   : > { %1467 = vmatpush1.bf16.msra.mxu1 %v2723_v11  ;;  %v2753_v31 = vld [vmem:[%s3426_s7 + $0x150] ss:$24 sps:$4 sm:$0xff]   ;;  %v2755_v33 = vld [vmem:[%s3426_s7 + $0x184] ss:$24 sps:$4 sm:$0xff]   ;;  %v2759_v35 = vld [vmem:[%s3426_s7 + $0x180] ss:$24 sps:$4 sm:$0xff]  }
  0x9e   : > { %1508 = vmatpush1.bf16.msra.mxu0 %v2724_v12  ;;  %1468 = vmatprep.subr.bf16.mxu1 %v2725_v13  ;;  %v2754_v32 = vld [vmem:[%s3426_s7 + $0x450] ss:$24 sps:$4 sm:$0xff]   ;;  %v2757_v34 = vld [vmem:[%s3426_s7 + $0x484] ss:$24 sps:$4 sm:$0xff]   ;;  %v2760_v36 = vld [vmem:[%s3426_s7 + $0x480] ss:$24 sps:$4 sm:$0xff]  }
  0x9f   : > { %1509 = vmatprep.subr.bf16.mxu0 %v2727_v14  ;;  %v2761_v37 = vld [vmem:[%s3426_s7 + $0x1b4] ss:$24 sps:$4 sm:$0xff]   ;;  %v3199_v39 = vmov 1966171168   ;;  %v2765_v42 = vld [vmem:[%s3426_s7 + $0x1b0] ss:$24 sps:$4 sm:$0xff]  }
  0xa0   : > { %v2763_v38 = vld [vmem:[%s3426_s7 + $0x4b4] ss:$24 sps:$4 sm:$0xff]   ;;  %v483_v40 = vunpack.c.l.s4 %v3199_v39  ;;  %v2766_v43 = vld [vmem:[%s3426_s7 + $0x4b0] ss:$24 sps:$4 sm:$0xff]   ;;  %v2767_v44 = vld [vmem:[%s3426_s7 + $0x1e4] ss:$24 sps:$4 sm:$0xff]  }
  0xa1   : > { %1469 = vmatpush1.bf16.msra.mxu1 %v2729_v15  ;;  %v2769_v45 = vld [vmem:[%s3426_s7 + $0x4e4] ss:$24 sps:$4 sm:$0xff]   ;;  %v3484_v47 = vshrl.u32 %v485_v41, 7  ;;  %v2771_v48 = vld [vmem:[%s3426_s7 + $0x1e0] ss:$24 sps:$4 sm:$0xff]   ;;  %p2406_p12 = scmp.ne.s32.totalorder %s3246_s19, 1 }
  0xa2   : > { %1510 = vmatpush1.bf16.msra.mxu0 %v2730_v16  ;;  %1470 = vmatprep.subr.bf16.mxu1 %v2731_v17  ;;  %v484_v46 = vunpack.c.0.s8 %v483_v40  ;;  %v2772_v49 = vld [vmem:[%s3426_s7 + $0x4e0] ss:$24 sps:$4 sm:$0xff]   ;;  %v2773_v50 = vld [vmem:[%s3426_s7 + $0x214] ss:$24 sps:$4 sm:$0xff]   ;;  %v2777_v54 = vld [vmem:[%s3426_s7 + $0x210] ss:$24 sps:$4 sm:$0xff]  }
  0xa3   : > { %1511 = vmatprep.subr.bf16.mxu0 %v2733_v18  ;;  %v2775_v51 = vld [vmem:[%s3426_s7 + $0x514] ss:$24 sps:$4 sm:$0xff]   ;;  %v2213_v53 = vld.sshfl [vmem:[%s3419_s10] sm:$0x33 pattern:$0x75316420] }
  0xa4   : > { %v487_v52 = vsub.s32 %v484_v46, %v3484_v47  ;;  %v2778_v55 = vld [vmem:[%s3426_s7 + $0x510] ss:$24 sps:$4 sm:$0xff]   ;;  %v481_v56 = vcombine.high %v2213_v53, %v2213_v53  ;;  %v2779_v57 = vld [vmem:[%s3426_s7 + $0x244] ss:$24 sps:$4 sm:$0xff]   ;;  %v2783_v60 = vld [vmem:[%s3426_s7 + $0x240] ss:$24 sps:$4 sm:$0xff]  }
  0xa5   : > { %1471 = vmatpush1.bf16.msra.mxu1 %v2735_v19  ;;  %v2781_v58 = vld [vmem:[%s3426_s7 + $0x544] ss:$24 sps:$4 sm:$0xff]   ;;  %v2784_v61 = vld [vmem:[%s3426_s7 + $0x540] ss:$24 sps:$4 sm:$0xff]   ;;  %v2785_v63 = vld [vmem:[%s3426_s7 + $0x274] ss:$24 sps:$4 sm:$0xff]  }
  0xa6   : > { %1512 = vmatpush1.bf16.msra.mxu0 %v2736_v20  ;;  %1472 = vmatprep.subr.bf16.mxu1 %v2737_v21  ;;  %v495_v59 = vrot.slane %v481_v56, %v487_v52  ;;  %v2787_v0 = vld [vmem:[%s3426_s7 + $0x574] ss:$24 sps:$4 sm:$0xff]   ;;  %v2789_v1 = vld [vmem:[%s3426_s7 + $0x270] ss:$24 sps:$4 sm:$0xff]   ;;  %v2791_v3 = vld [vmem:[%s3426_s7 + $0x2a4] ss:$24 sps:$4 sm:$0xff]   ;;  %v3512_v10 = vrot.slane %v2213_v53, %v487_v52 }
  0xa7   : > { %1513 = vmatprep.subr.bf16.mxu0 %v2739_v22  ;;  %v2790_v2 = vld [vmem:[%s3426_s7 + $0x570] ss:$24 sps:$4 sm:$0xff]   ;;  %v2793_v4 = vld [vmem:[%s3426_s7 + $0x5a4] ss:$24 sps:$4 sm:$0xff]   ;;  %v2795_v5 = vld [vmem:[%s3426_s7 + $0x2a0] ss:$24 sps:$4 sm:$0xff]  }
  0xa8   : > { %v3498_v62 = vcombine.high %v495_v59, %v495_v59  ;;  %1494 = vmatprep.mubr.bf16.mxu1 %v495_v59  ;;  %v2796_v6 = vld [vmem:[%s3426_s7 + $0x5a0] ss:$24 sps:$4 sm:$0xff]   ;;  %v2797_v7 = vld [vmem:[%s3426_s7 + $0x2d4] ss:$24 sps:$4 sm:$0xff]   ;;  %v2801_v9 = vld [vmem:[%s3426_s7 + $0x2d0] ss:$24 sps:$4 sm:$0xff]   ;;  %v3519_v14 = vcombine.high %v3512_v10, %v3512_v10 }
  0xa9   : > { %1473 = vmatpush1.bf16.msra.mxu1 %v2741_v23  ;;  %v2799_v8 = vld [vmem:[%s3426_s7 + $0x5d4] ss:$24 sps:$4 sm:$0xff]   ;;  %v2802_v11 = vld [vmem:[%s3426_s7 + $0x5d0] ss:$24 sps:$4 sm:$0xff]   ;;  %v2814_v18 = vld [vmem:[%s3426_s7 + $0x44] ss:$24 sps:$4 sm:$0xff]  }
  0xaa   : > { %1514 = vmatpush1.bf16.msra.mxu0 %v2742_v24  ;;  %1474 = vmatprep.subr.bf16.mxu1 %v2743_v25  ;;  %v2805_v12 = vld [vmem:[%s3426_s7 + $0xc] ss:$24 sps:$4 sm:$0xff]   ;;  %v2803_v15 = vld [vmem:[%s3426_s7 + $0x8] ss:$24 sps:$4 sm:$0xff]   ;;  %v2811_v17 = vld [vmem:[%s3426_s7 + $0x3c] ss:$24 sps:$4 sm:$0xff]  }
  0xab   : > { %1515 = vmatprep.subr.bf16.mxu0 %v2745_v26  ;;  %1535 = vmatprep.mubr.bf16.mxu0 %v3498_v62  ;;  %v2808_v13 = vld [vmem:[%s3426_s7 + $0x14] ss:$24 sps:$4 sm:$0xff]   ;;  %v2806_v16 = vld [vmem:[%s3426_s7 + $0x10] ss:$24 sps:$4 sm:$0xff]   ;;  %v2812_v20 = vld [vmem:[%s3426_s7 + $0x40] ss:$24 sps:$4 sm:$0xff]  }
  0xac   : > { %v2809_v19 = vld [vmem:[%s3426_s7 + $0x38] ss:$24 sps:$4 sm:$0xff]   ;;  %v2817_v21 = vld [vmem:[%s3426_s7 + $0x6c] ss:$24 sps:$4 sm:$0xff]   ;;  %v2815_v23 = vld [vmem:[%s3426_s7 + $0x68] ss:$24 sps:$4 sm:$0xff]  }
  0xad   : > { %1475 = vmatpush1.bf16.msra.mxu1 %v2747_v27  ;;  %v2820_v22 = vld [vmem:[%s3426_s7 + $0x74] ss:$24 sps:$4 sm:$0xff]   ;;  %v2818_v24 = vld [vmem:[%s3426_s7 + $0x70] ss:$24 sps:$4 sm:$0xff]   ;;  %v2826_v26 = vld [vmem:[%s3426_s7 + $0xa4] ss:$24 sps:$4 sm:$0xff]  }
  0xae   : > { %1516 = vmatpush1.bf16.msra.mxu0 %v2748_v28  ;;  %1476 = vmatprep.subr.bf16.mxu1 %v2749_v29  ;;  %v2823_v25 = vld [vmem:[%s3426_s7 + $0x9c] ss:$24 sps:$4 sm:$0xff]   ;;  %v2821_v27 = vld [vmem:[%s3426_s7 + $0x98] ss:$24 sps:$4 sm:$0xff]   ;;  %v2829_v29 = vld [vmem:[%s3426_s7 + $0xcc] ss:$24 sps:$4 sm:$0xff]  }
  0xaf   : > { %1517 = vmatprep.subr.bf16.mxu0 %v2751_v30  ;;  %v2824_v28 = vld [vmem:[%s3426_s7 + $0xa0] ss:$24 sps:$4 sm:$0xff]   ;;  %v2832_v30 = vld [vmem:[%s3426_s7 + $0xd4] ss:$24 sps:$4 sm:$0xff]   ;;  %v2842_v40 = vld [vmem:[%s3426_s7 + $0x130] ss:$24 sps:$4 sm:$0xff]  }
  0xb0   : > { %v2839_v39 = vld [vmem:[%s3426_s7 + $0x128] ss:$24 sps:$4 sm:$0xff]   ;;  %v2847_v41 = vld [vmem:[%s3426_s7 + $0x15c] ss:$24 sps:$4 sm:$0xff]   ;;  %v2857_v52 = vld [vmem:[%s3426_s7 + $0x1b8] ss:$24 sps:$4 sm:$0xff]  }
  0xb1   : > { %1477 = vmatpush1.bf16.msra.mxu1 %v2753_v31  ;;  %v2827_v31 = vld [vmem:[%s3426_s7 + $0xc8] ss:$24 sps:$4 sm:$0xff]   ;;  %v2856_v46 = vld [vmem:[%s3426_s7 + $0x194] ss:$24 sps:$4 sm:$0xff]  }
  0xb2   : > { %1518 = vmatpush1.bf16.msra.mxu0 %v2754_v32  ;;  %1478 = vmatprep.subr.bf16.mxu1 %v2755_v33  ;;  %v2830_v32 = vld [vmem:[%s3426_s7 + $0xd0] ss:$24 sps:$4 sm:$0xff]   ;;  %v2835_v33 = vld [vmem:[%s3426_s7 + $0xfc] ss:$24 sps:$4 sm:$0xff]   ;;  %v2860_v53 = vld [vmem:[%s3426_s7 + $0x1c0] ss:$24 sps:$4 sm:$0xff]  }
  0xb3   : > { %1519 = vmatprep.subr.bf16.mxu0 %v2757_v34  ;;  %v2838_v34 = vld [vmem:[%s3426_s7 + $0x104] ss:$24 sps:$4 sm:$0xff]   ;;  %v2863_v56 = vld [vmem:[%s3426_s7 + $0x1e8] ss:$24 sps:$4 sm:$0xff]  }
  0xb5   : > { %1479 = vmatpush1.bf16.msra.mxu1 %v2759_v35  ;;  %v2833_v35 = vld [vmem:[%s3426_s7 + $0xf8] ss:$24 sps:$4 sm:$0xff]  }
  0xb6   : > { %1520 = vmatpush1.bf16.msra.mxu0 %v2760_v36  ;;  %1480 = vmatprep.subr.bf16.mxu1 %v2761_v37  ;;  %v2836_v36 = vld [vmem:[%s3426_s7 + $0x100] ss:$24 sps:$4 sm:$0xff]   ;;  %v2841_v37 = vld [vmem:[%s3426_s7 + $0x12c] ss:$24 sps:$4 sm:$0xff]  }
  0xb7   : > { %1521 = vmatprep.subr.bf16.mxu0 %v2763_v38  ;;  %v2844_v38 = vld [vmem:[%s3426_s7 + $0x134] ss:$24 sps:$4 sm:$0xff]  }
  0xb9   : > { %1481 = vmatpush1.bf16.msra.mxu1 %v2765_v42  ;;  %v2850_v42 = vld [vmem:[%s3426_s7 + $0x164] ss:$24 sps:$4 sm:$0xff]  }
  0xba   : > { %1522 = vmatpush1.bf16.msra.mxu0 %v2766_v43  ;;  %1482 = vmatprep.subr.bf16.mxu1 %v2767_v44  ;;  %v2845_v43 = vld [vmem:[%s3426_s7 + $0x158] ss:$24 sps:$4 sm:$0xff]  }
  0xbb   : > { %1523 = vmatprep.subr.bf16.mxu0 %v2769_v45  ;;  %v2848_v44 = vld [vmem:[%s3426_s7 + $0x160] ss:$24 sps:$4 sm:$0xff]   ;;  %v2853_v45 = vld [vmem:[%s3426_s7 + $0x18c] ss:$24 sps:$4 sm:$0xff]  }
  0xbd   : > { %1483 = vmatpush1.bf16.msra.mxu1 %v2771_v48  ;;  %v2851_v48 = vld [vmem:[%s3426_s7 + $0x188] ss:$24 sps:$4 sm:$0xff]  }
  0xbe   : > { %1524 = vmatpush1.bf16.msra.mxu0 %v2772_v49  ;;  %1484 = vmatprep.subr.bf16.mxu1 %v2773_v50  ;;  %v2854_v49 = vld [vmem:[%s3426_s7 + $0x190] ss:$24 sps:$4 sm:$0xff]   ;;  %v2859_v50 = vld [vmem:[%s3426_s7 + $0x1bc] ss:$24 sps:$4 sm:$0xff]  }
  0xbf   : > { %1525 = vmatprep.subr.bf16.mxu0 %v2775_v51  ;;  %v2862_v51 = vld [vmem:[%s3426_s7 + $0x1c4] ss:$24 sps:$4 sm:$0xff]  }
  0xc1   : > { %1485 = vmatpush1.bf16.msra.mxu1 %v2777_v54  ;;  %v2865_v54 = vld [vmem:[%s3426_s7 + $0x1ec] ss:$24 sps:$4 sm:$0xff]  }
  0xc2   : > { %1526 = vmatpush1.bf16.msra.mxu0 %v2778_v55  ;;  %1486 = vmatprep.subr.bf16.mxu1 %v2779_v57  ;;  %v2868_v55 = vld [vmem:[%s3426_s7 + $0x1f4] ss:$24 sps:$4 sm:$0xff]   ;;  %v2866_v57 = vld [vmem:[%s3426_s7 + $0x1f0] ss:$24 sps:$4 sm:$0xff]  }
  0xc3   : > { %1527 = vmatprep.subr.bf16.mxu0 %v2781_v58  ;;  %v2871_v58 = vld [vmem:[%s3426_s7 + $0x21c] ss:$24 sps:$4 sm:$0xff]  }
  0xc5   : > { %1487 = vmatpush1.bf16.msra.mxu1 %v2783_v60  ;;  %v2869_v60 = vld [vmem:[%s3426_s7 + $0x218] ss:$24 sps:$4 sm:$0xff]  }
  0xc6   : > { %1528 = vmatpush1.bf16.msra.mxu0 %v2784_v61  ;;  %1488 = vmatprep.subr.bf16.mxu1 %v2785_v63  ;;  %v2872_v61 = vld [vmem:[%s3426_s7 + $0x220] ss:$24 sps:$4 sm:$0xff]   ;;  %v2877_v63 = vld [vmem:[%s3426_s7 + $0x24c] ss:$24 sps:$4 sm:$0xff]  }
  0xc7   : > { %1529 = vmatprep.subr.bf16.mxu0 %v2787_v0  ;;  %v2880_v0 = vld [vmem:[%s3426_s7 + $0x254] ss:$24 sps:$4 sm:$0xff]  }
  0xc9   : > { %1489 = vmatpush1.bf16.msra.mxu1 %v2789_v1  ;;  %v2875_v1 = vld [vmem:[%s3426_s7 + $0x248] ss:$24 sps:$4 sm:$0xff]  }
  0xca   : > { %1530 = vmatpush1.bf16.msra.mxu0 %v2790_v2  ;;  %1490 = vmatprep.subr.bf16.mxu1 %v2791_v3  ;;  %v2878_v2 = vld [vmem:[%s3426_s7 + $0x250] ss:$24 sps:$4 sm:$0xff]   ;;  %v2883_v3 = vld [vmem:[%s3426_s7 + $0x27c] ss:$24 sps:$4 sm:$0xff]  }
  0xcb   : > { %1531 = vmatprep.subr.bf16.mxu0 %v2793_v4  ;;  %v2886_v4 = vld [vmem:[%s3426_s7 + $0x284] ss:$24 sps:$4 sm:$0xff]  }
  0xcd   : > { %1491 = vmatpush1.bf16.msra.mxu1 %v2795_v5  ;;  %v2881_v5 = vld [vmem:[%s3426_s7 + $0x278] ss:$24 sps:$4 sm:$0xff]  }
  0xce   : > { %1532 = vmatpush1.bf16.msra.mxu0 %v2796_v6  ;;  %1492 = vmatprep.subr.bf16.mxu1 %v2797_v7  ;;  %v2884_v6 = vld [vmem:[%s3426_s7 + $0x280] ss:$24 sps:$4 sm:$0xff]   ;;  %v2889_v7 = vld [vmem:[%s3426_s7 + $0x2ac] ss:$24 sps:$4 sm:$0xff]  }
  0xcf   : > { %1533 = vmatprep.subr.bf16.mxu0 %v2799_v8  ;;  %v2892_v8 = vld [vmem:[%s3426_s7 + $0x2b4] ss:$24 sps:$4 sm:$0xff]  }
  0xd1   : > { %1493 = vmatpush1.bf16.msra.mxu1 %v2801_v9  ;;  %v2887_v9 = vld [vmem:[%s3426_s7 + $0x2a8] ss:$24 sps:$4 sm:$0xff]  }
  0xd2   : > { %1534 = vmatpush1.bf16.msra.mxu0 %v2802_v11  ;;  %1544 = vmatprep.subr.bf16.mxu1 %v2805_v12  ;;  %v2890_v11 = vld [vmem:[%s3426_s7 + $0x2b0] ss:$24 sps:$4 sm:$0xff]   ;;  %v2895_v12 = vld [vmem:[%s3426_s7 + $0x2dc] ss:$24 sps:$4 sm:$0xff]  }
  0xd3   : > { %1626 = vmatprep.subr.bf16.mxu0 %v2808_v13  ;;  %v2898_v13 = vld [vmem:[%s3426_s7 + $0x2e4] ss:$24 sps:$4 sm:$0xff]  }
  0xd4   : > { %1495 = vmatmul.mubr.bf16.vlgmr.msra.gmra.mrb[0].mxu1 %v3512_v10 }
  0xd5   : > { %1536 = vmatmul.mubr.bf16.vlgmr.msra.gmra.mrb[0].mxu0 %v3519_v14  ;;  %1545 = vmatpush1.bf16.msra.mxu1 %v2803_v15  ;;  %v2893_v15 = vld [vmem:[%s3426_s7 + $0x2d8] ss:$24 sps:$4 sm:$0xff]  }
  0xd6   : > { %1627 = vmatpush1.bf16.msra.mxu0 %v2806_v16  ;;  %1546 = vmatprep.subr.bf16.mxu1 %v2811_v17  ;;  %v2896_v16 = vld [vmem:[%s3426_s7 + $0x2e0] ss:$24 sps:$4 sm:$0xff]   ;;  %v2901_v17 = vld [vmem:[%s3426_s7 + $0x30c] ss:$24 sps:$4 sm:$0xff]  }
  0xd7   : > { %1628 = vmatprep.subr.bf16.mxu0 %v2814_v18  ;;  %1576 = vmatprep.mubr.bf16.mxu1 %v495_v59  ;;  %v2904_v18 = vld [vmem:[%s3426_s7 + $0x314] ss:$24 sps:$4 sm:$0xff]  }
  0xd8   : > { %1658 = vmatprep.mubr.bf16.mxu0 %v495_v59  ;;  %v2874_v59 = vld [vmem:[%s3426_s7 + $0x224] ss:$24 sps:$4 sm:$0xff]  }
  0xd9   : > { %1547 = vmatpush1.bf16.msra.mxu1 %v2809_v19  ;;  %v2899_v19 = vld [vmem:[%s3426_s7 + $0x308] ss:$24 sps:$4 sm:$0xff]  }
  0xda   : > { %1629 = vmatpush1.bf16.msra.mxu0 %v2812_v20  ;;  %1548 = vmatprep.subr.bf16.mxu1 %v2817_v21  ;;  %v2902_v20 = vld [vmem:[%s3426_s7 + $0x310] ss:$24 sps:$4 sm:$0xff]   ;;  %v2907_v21 = vld [vmem:[%s3426_s7 + $0x33c] ss:$24 sps:$4 sm:$0xff]  }
  0xdb   : > { %1630 = vmatprep.subr.bf16.mxu0 %v2820_v22  ;;  %v2910_v22 = vld [vmem:[%s3426_s7 + $0x344] ss:$24 sps:$4 sm:$0xff]  }
  0xdd   : > { %1549 = vmatpush1.bf16.msra.mxu1 %v2815_v23  ;;  %v2905_v23 = vld [vmem:[%s3426_s7 + $0x338] ss:$24 sps:$4 sm:$0xff]  }
  0xde   : > { %1631 = vmatpush1.bf16.msra.mxu0 %v2818_v24  ;;  %1550 = vmatprep.subr.bf16.mxu1 %v2823_v25  ;;  %v2908_v24 = vld [vmem:[%s3426_s7 + $0x340] ss:$24 sps:$4 sm:$0xff]   ;;  %v2913_v25 = vld [vmem:[%s3426_s7 + $0x36c] ss:$24 sps:$4 sm:$0xff]  }
  0xdf   : > { %1632 = vmatprep.subr.bf16.mxu0 %v2826_v26  ;;  %v2916_v26 = vld [vmem:[%s3426_s7 + $0x374] ss:$24 sps:$4 sm:$0xff]  }
  0xe1   : > { %1551 = vmatpush1.bf16.msra.mxu1 %v2821_v27  ;;  %v2914_v27 = vld [vmem:[%s3426_s7 + $0x370] ss:$24 sps:$4 sm:$0xff]  }
  0xe2   : > { %1633 = vmatpush1.bf16.msra.mxu0 %v2824_v28  ;;  %1552 = vmatprep.subr.bf16.mxu1 %v2829_v29  ;;  %v2919_v28 = vld [vmem:[%s3426_s7 + $0x39c] ss:$24 sps:$4 sm:$0xff]  }
  0xe3   : > { %1634 = vmatprep.subr.bf16.mxu0 %v2832_v30  ;;  %v2922_v29 = vld [vmem:[%s3426_s7 + $0x3a4] ss:$24 sps:$4 sm:$0xff]   ;;  %v2917_v30 = vld [vmem:[%s3426_s7 + $0x398] ss:$24 sps:$4 sm:$0xff]  }
  0xe5   : > { %1553 = vmatpush1.bf16.msra.mxu1 %v2827_v31  ;;  %v2920_v31 = vld [vmem:[%s3426_s7 + $0x3a0] ss:$24 sps:$4 sm:$0xff]  }
  0xe6   : > { %1635 = vmatpush1.bf16.msra.mxu0 %v2830_v32  ;;  %1554 = vmatprep.subr.bf16.mxu1 %v2835_v33  ;;  %v2928_v32 = vld [vmem:[%s3426_s7 + $0x3d4] ss:$24 sps:$4 sm:$0xff]   ;;  %v2923_v33 = vld [vmem:[%s3426_s7 + $0x3c8] ss:$24 sps:$4 sm:$0xff]  }
  0xe7   : > { %1636 = vmatprep.subr.bf16.mxu0 %v2838_v34  ;;  %v2926_v34 = vld [vmem:[%s3426_s7 + $0x3d0] ss:$24 sps:$4 sm:$0xff]  }
  0xe9   : > { %1555 = vmatpush1.bf16.msra.mxu1 %v2833_v35  ;;  %v2931_v35 = vld [vmem:[%s3426_s7 + $0x3fc] ss:$24 sps:$4 sm:$0xff]  }
  0xea   : > { %1637 = vmatpush1.bf16.msra.mxu0 %v2836_v36  ;;  %1556 = vmatprep.subr.bf16.mxu1 %v2841_v37  ;;  %v2934_v36 = vld [vmem:[%s3426_s7 + $0x404] ss:$24 sps:$4 sm:$0xff]   ;;  %v2929_v37 = vld [vmem:[%s3426_s7 + $0x3f8] ss:$24 sps:$4 sm:$0xff]  }
  0xeb   : > { %1638 = vmatprep.subr.bf16.mxu0 %v2844_v38  ;;  %v2932_v38 = vld [vmem:[%s3426_s7 + $0x400] ss:$24 sps:$4 sm:$0xff]  }
  0xed   : > { %1557 = vmatpush1.bf16.msra.mxu1 %v2839_v39  ;;  %v2937_v39 = vld [vmem:[%s3426_s7 + $0x42c] ss:$24 sps:$4 sm:$0xff]  }
  0xee   : > { %1639 = vmatpush1.bf16.msra.mxu0 %v2842_v40  ;;  %1558 = vmatprep.subr.bf16.mxu1 %v2847_v41  ;;  %v2940_v40 = vld [vmem:[%s3426_s7 + $0x434] ss:$24 sps:$4 sm:$0xff]   ;;  %v2935_v41 = vld [vmem:[%s3426_s7 + $0x428] ss:$24 sps:$4 sm:$0xff]  }
  0xef   : > { %1640 = vmatprep.subr.bf16.mxu0 %v2850_v42  ;;  %v2938_v42 = vld [vmem:[%s3426_s7 + $0x430] ss:$24 sps:$4 sm:$0xff]  }
  0xf1   : > { %1559 = vmatpush1.bf16.msra.mxu1 %v2845_v43  ;;  %v2943_v43 = vld [vmem:[%s3426_s7 + $0x45c] ss:$24 sps:$4 sm:$0xff]  }
  0xf2   : > { %1641 = vmatpush1.bf16.msra.mxu0 %v2848_v44  ;;  %1560 = vmatprep.subr.bf16.mxu1 %v2853_v45  ;;  %v2946_v44 = vld [vmem:[%s3426_s7 + $0x464] ss:$24 sps:$4 sm:$0xff]   ;;  %v2941_v45 = vld [vmem:[%s3426_s7 + $0x458] ss:$24 sps:$4 sm:$0xff]  }
  0xf3   : > { %1642 = vmatprep.subr.bf16.mxu0 %v2856_v46  ;;  %v2944_v46 = vld [vmem:[%s3426_s7 + $0x460] ss:$24 sps:$4 sm:$0xff]  }
  0xf5   : > { %1561 = vmatpush1.bf16.msra.mxu1 %v2851_v48  ;;  %v2949_v48 = vld [vmem:[%s3426_s7 + $0x48c] ss:$24 sps:$4 sm:$0xff]  }
  0xf6   : > { %1643 = vmatpush1.bf16.msra.mxu0 %v2854_v49  ;;  %1562 = vmatprep.subr.bf16.mxu1 %v2859_v50  ;;  %v2952_v49 = vld [vmem:[%s3426_s7 + $0x494] ss:$24 sps:$4 sm:$0xff]   ;;  %v2947_v50 = vld [vmem:[%s3426_s7 + $0x488] ss:$24 sps:$4 sm:$0xff]  }
  0xf7   : > { %1644 = vmatprep.subr.bf16.mxu0 %v2862_v51  ;;  %v2950_v51 = vld [vmem:[%s3426_s7 + $0x490] ss:$24 sps:$4 sm:$0xff]  }
  0xf9   : > { %1563 = vmatpush1.bf16.msra.mxu1 %v2857_v52  ;;  %v2955_v52 = vld [vmem:[%s3426_s7 + $0x4bc] ss:$24 sps:$4 sm:$0xff]  }
  0xfa   : > { %1645 = vmatpush1.bf16.msra.mxu0 %v2860_v53  ;;  %1564 = vmatprep.subr.bf16.mxu1 %v2865_v54  ;;  %v2958_v53 = vld [vmem:[%s3426_s7 + $0x4c4] ss:$24 sps:$4 sm:$0xff]   ;;  %v2953_v54 = vld [vmem:[%s3426_s7 + $0x4b8] ss:$24 sps:$4 sm:$0xff]  }
  0xfb   : > { %1646 = vmatprep.subr.bf16.mxu0 %v2868_v55  ;;  %v2956_v55 = vld [vmem:[%s3426_s7 + $0x4c0] ss:$24 sps:$4 sm:$0xff]  }
  0xfd   : > { %1565 = vmatpush1.bf16.msra.mxu1 %v2863_v56  ;;  %v2961_v56 = vld [vmem:[%s3426_s7 + $0x4ec] ss:$24 sps:$4 sm:$0xff]  }
  0xfe   : > { %1647 = vmatpush1.bf16.msra.mxu0 %v2866_v57  ;;  %1566 = vmatprep.subr.bf16.mxu1 %v2871_v58  ;;  %v2964_v57 = vld [vmem:[%s3426_s7 + $0x4f4] ss:$24 sps:$4 sm:$0xff]   ;;  %v2959_v58 = vld [vmem:[%s3426_s7 + $0x4e8] ss:$24 sps:$4 sm:$0xff]  }
  0xff   : > { %1648 = vmatprep.subr.bf16.mxu0 %v2874_v59  ;;  %v2962_v59 = vld [vmem:[%s3426_s7 + $0x4f0] ss:$24 sps:$4 sm:$0xff]  }
 0x101   : > { %1567 = vmatpush1.bf16.msra.mxu1 %v2869_v60  ;;  %v2967_v60 = vld [vmem:[%s3426_s7 + $0x51c] ss:$24 sps:$4 sm:$0xff]  }
 0x102   : > { %1649 = vmatpush1.bf16.msra.mxu0 %v2872_v61  ;;  %1568 = vmatprep.subr.bf16.mxu1 %v2877_v63  ;;  %v2970_v61 = vld [vmem:[%s3426_s7 + $0x524] ss:$24 sps:$4 sm:$0xff]   ;;  %v2965_v63 = vld [vmem:[%s3426_s7 + $0x518] ss:$24 sps:$4 sm:$0xff]  }
 0x103   : > { %1650 = vmatprep.subr.bf16.mxu0 %v2880_v0  ;;  %v2968_v0 = vld [vmem:[%s3426_s7 + $0x520] ss:$24 sps:$4 sm:$0xff]  }
 0x105   : > { %1569 = vmatpush1.bf16.msra.mxu1 %v2875_v1  ;;  %v2973_v1 = vld [vmem:[%s3426_s7 + $0x54c] ss:$24 sps:$4 sm:$0xff]  }
 0x106   : > { %1651 = vmatpush1.bf16.msra.mxu0 %v2878_v2  ;;  %1570 = vmatprep.subr.bf16.mxu1 %v2883_v3  ;;  %v2976_v2 = vld [vmem:[%s3426_s7 + $0x554] ss:$24 sps:$4 sm:$0xff]   ;;  %v2971_v3 = vld [vmem:[%s3426_s7 + $0x548] ss:$24 sps:$4 sm:$0xff]  }
 0x107   : > { %1652 = vmatprep.subr.bf16.mxu0 %v2886_v4  ;;  %v2974_v4 = vld [vmem:[%s3426_s7 + $0x550] ss:$24 sps:$4 sm:$0xff]  }
 0x109   : > { %1571 = vmatpush1.bf16.msra.mxu1 %v2881_v5  ;;  %v2979_v5 = vld [vmem:[%s3426_s7 + $0x57c] ss:$24 sps:$4 sm:$0xff]  }
 0x10a   : > { %1653 = vmatpush1.bf16.msra.mxu0 %v2884_v6  ;;  %1572 = vmatprep.subr.bf16.mxu1 %v2889_v7  ;;  %v2982_v6 = vld [vmem:[%s3426_s7 + $0x584] ss:$24 sps:$4 sm:$0xff]   ;;  %v2977_v7 = vld [vmem:[%s3426_s7 + $0x578] ss:$24 sps:$4 sm:$0xff]  }
 0x10b   : > { %1654 = vmatprep.subr.bf16.mxu0 %v2892_v8  ;;  %v2980_v8 = vld [vmem:[%s3426_s7 + $0x580] ss:$24 sps:$4 sm:$0xff]  }
 0x10d   : > { %1573 = vmatpush1.bf16.msra.mxu1 %v2887_v9  ;;  %v2985_v9 = vld [vmem:[%s3426_s7 + $0x5ac] ss:$24 sps:$4 sm:$0xff]  }
 0x10e   : > { %1655 = vmatpush1.bf16.msra.mxu0 %v2890_v11  ;;  %1574 = vmatprep.subr.bf16.mxu1 %v2895_v12  ;;  %v2988_v11 = vld [vmem:[%s3426_s7 + $0x5b4] ss:$24 sps:$4 sm:$0xff]   ;;  %v2983_v12 = vld [vmem:[%s3426_s7 + $0x5a8] ss:$24 sps:$4 sm:$0xff]  }
 0x10f   : > { %1656 = vmatprep.subr.bf16.mxu0 %v2898_v13  ;;  %v2986_v13 = vld [vmem:[%s3426_s7 + $0x5b0] ss:$24 sps:$4 sm:$0xff]  }
 0x111   : > { %1575 = vmatpush1.bf16.msra.mxu1 %v2893_v15  ;;  %v2991_v15 = vld [vmem:[%s3426_s7 + $0x5dc] ss:$24 sps:$4 sm:$0xff]  }
 0x112   : > { %1657 = vmatpush1.bf16.msra.mxu0 %v2896_v16  ;;  %1585 = vmatprep.subr.bf16.mxu1 %v2901_v17  ;;  %v2994_v16 = vld [vmem:[%s3426_s7 + $0x5e4] ss:$24 sps:$4 sm:$0xff]   ;;  %v2989_v17 = vld [vmem:[%s3426_s7 + $0x5d8] ss:$24 sps:$4 sm:$0xff]  }
 0x113   : > { %1667 = vmatprep.subr.bf16.mxu0 %v2904_v18  ;;  %v2992_v18 = vld [vmem:[%s3426_s7 + $0x5e0] ss:$24 sps:$4 sm:$0xff]  }
 0x114   : > { %1577 = vmatmul.mubr.bf16.vlgmr.msra.gmra.mrb[4].mxu1 %v3512_v10 }
 0x115   : > { %1659 = vmatmul.mubr.bf16.vlgmr.msra.gmra.mrb[4].mxu0 %v3512_v10  ;;  %1586 = vmatpush1.bf16.msra.mxu1 %v2899_v19  ;;  %v2911_v10 = vld [vmem:[%s3426_s7 + $0x368] ss:$24 sps:$4 sm:$0xff]  }
 0x116   : > { %1668 = vmatpush1.bf16.msra.mxu0 %v2902_v20  ;;  %1587 = vmatprep.subr.bf16.mxu1 %v2907_v21 }
 0x117   : > { %1669 = vmatprep.subr.bf16.mxu0 %v2910_v22  ;;  %1617 = vmatprep.mubr.bf16.mxu1 %v3498_v62 }
 0x118   : > { %1699 = vmatprep.mubr.bf16.mxu0 %v3498_v62  ;;  %v2925_v62 = vld [vmem:[%s3426_s7 + $0x3cc] ss:$24 sps:$4 sm:$0xff]  }
 0x119   : > { %1588 = vmatpush1.bf16.msra.mxu1 %v2905_v23 }
 0x11a   : > { %1670 = vmatpush1.bf16.msra.mxu0 %v2908_v24  ;;  %1589 = vmatprep.subr.bf16.mxu1 %v2913_v25 }
 0x11b   : > { %1671 = vmatprep.subr.bf16.mxu0 %v2916_v26 }
 0x11d   : > { %1590 = vmatpush1.bf16.msra.mxu1 %v2911_v10 }
 0x11e   : > { %1672 = vmatpush1.bf16.msra.mxu0 %v2914_v27  ;;  %1591 = vmatprep.subr.bf16.mxu1 %v2919_v28 }
 0x11f   : > { %1673 = vmatprep.subr.bf16.mxu0 %v2922_v29  ;;  %v3200_v29 = vmov 1983009808  }
 0x121   : > { %1592 = vmatpush1.bf16.msra.mxu1 %v2917_v30  ;;  %v1717_v30 = vunpack.c.l.s4 %v3200_v29  ;;  %v1806_v29 = vld [vmem:[#allocation8 + $0x1b8] sm:$0xff] (!%p2406_p12) }
 0x122   : > { %1674 = vmatpush1.bf16.msra.mxu0 %v2920_v31  ;;  %1593 = vmatprep.subr.bf16.mxu1 %v2925_v62 }
 0x123   : > { %1675 = vmatprep.subr.bf16.mxu0 %v2928_v32  ;;  %v1718_v31 = vunpack.c.0.s8 %v1717_v30 }
 0x125   : > { %1594 = vmatpush1.bf16.msra.mxu1 %v2923_v33  ;;  %v3656_v62 = vsub.s32 %v1718_v31, %v3484_v47  ;;  %v1789_v31 = vld [vmem:[#allocation8 + $0x130] sm:$0xff] (!%p2406_p12) }
 0x126   : > { %1676 = vmatpush1.bf16.msra.mxu0 %v2926_v34  ;;  %1595 = vmatprep.subr.bf16.mxu1 %v2931_v35 }
 0x127   : > { %1677 = vmatprep.subr.bf16.mxu0 %v2934_v36 }
 0x129   : > { %1596 = vmatpush1.bf16.msra.mxu1 %v2929_v37 }
 0x12a   : > { %1678 = vmatpush1.bf16.msra.mxu0 %v2932_v38  ;;  %1597 = vmatprep.subr.bf16.mxu1 %v2937_v39  ;;  %v279_v39 = vld [vmem:[#allocation2 + $0x8] sm:$0xf] }
 0x12b   : > { %1679 = vmatprep.subr.bf16.mxu0 %v2940_v40 }
 0x12d   : > { %1598 = vmatpush1.bf16.msra.mxu1 %v2935_v41 }
 0x12e   : > { %1680 = vmatpush1.bf16.msra.mxu0 %v2938_v42  ;;  %1599 = vmatprep.subr.bf16.mxu1 %v2943_v43 }
 0x12f   : > { %1681 = vmatprep.subr.bf16.mxu0 %v2946_v44 }
 0x131   : > { %1600 = vmatpush1.bf16.msra.mxu1 %v2941_v45  ;;  %v278_v45 = vld [vmem:[#allocation2] sm:$0xff] }
 0x132   : > { %1682 = vmatpush1.bf16.msra.mxu0 %v2944_v46  ;;  %1601 = vmatprep.subr.bf16.mxu1 %v2949_v48 }
 0x133   : > { %1683 = vmatprep.subr.bf16.mxu0 %v2952_v49  ;;  %v1767_v49 = vld [vmem:[#allocation8 + $0x80] sm:$0xff] (!%p2406_p12) }
 0x135   : > { %1602 = vmatpush1.bf16.msra.mxu1 %v2947_v50  ;;  %v1768_v50 = vld [vmem:[#allocation8 + $0x88] sm:$0xff] (!%p2406_p12) }
 0x136   : > { %1684 = vmatpush1.bf16.msra.mxu0 %v2950_v51  ;;  %1603 = vmatprep.subr.bf16.mxu1 %v2955_v52  ;;  %v1751_v51 = vld [vmem:[#allocation8] sm:$0xff] (!%p2406_p12)  ;;  %v2519_v52 = vpack.c.bf16 (!%p2406_p12), %v1768_v50, %v1767_v49  ;;  %v1761_v49 = vld [vmem:[#allocation8 + $0x50] sm:$0xff] (!%p2406_p12) }
 0x137   : > { %1685 = vmatprep.subr.bf16.mxu0 %v2958_v53  ;;  %v1752_v53 = vld [vmem:[#allocation8 + $0x8] sm:$0xff] (!%p2406_p12) }
 0x139   : > { %1604 = vmatpush1.bf16.msra.mxu1 %v2953_v54  ;;  %v1799_v54 = vld [vmem:[#allocation8 + $0x180] sm:$0xff] (!%p2406_p12) }
 0x13a   : > { %1686 = vmatpush1.bf16.msra.mxu0 %v2956_v55  ;;  %1605 = vmatprep.subr.bf16.mxu1 %v2961_v56  ;;  %v1800_v55 = vld [vmem:[#allocation8 + $0x188] sm:$0xff] (!%p2406_p12)  ;;  %v2521_v56 = vpack.c.bf16 (!%p2406_p12), %v1752_v53, %v1751_v51  ;;  %v1793_v53 = vld [vmem:[#allocation8 + $0x150] sm:$0xff] (!%p2406_p12) }
 0x13b   : > { %1687 = vmatprep.subr.bf16.mxu0 %v2964_v57  ;;  %v2551_v57 = vpack.c.bf16 (!%p2406_p12), %v1800_v55, %v1799_v54  ;;  %v1794_v54 = vld [vmem:[#allocation8 + $0x158] sm:$0xff] (!%p2406_p12) }
 0x13d   : > { %1606 = vmatpush1.bf16.msra.mxu1 %v2959_v58  ;;  %v1783_v58 = vld [vmem:[#allocation8 + $0x100] sm:$0xff] (!%p2406_p12) }
 0x13e   : > { %1688 = vmatpush1.bf16.msra.mxu0 %v2962_v59  ;;  %1607 = vmatprep.subr.bf16.mxu1 %v2967_v60  ;;  %v1784_v59 = vld [vmem:[#allocation8 + $0x108] sm:$0xff] (!%p2406_p12)  ;;  %v1769_v60 = vld [vmem:[#allocation8 + $0x90] sm:$0xff] (!%p2406_p12) }
 0x13f   : > { %1689 = vmatprep.subr.bf16.mxu0 %v2970_v61  ;;  %v2553_v61 = vpack.c.bf16 (!%p2406_p12), %v1784_v59, %v1783_v58  ;;  %v1811_v58 = vld [vmem:[#allocation8 + $0x1e0] sm:$0xff] (!%p2406_p12)  ;;  %v1812_v59 = vld [vmem:[#allocation8 + $0x1e8] sm:$0xff] (!%p2406_p12) }
 0x141   : > { %1608 = vmatpush1.bf16.msra.mxu1 %v2965_v63  ;;  %v1770_v63 = vld [vmem:[#allocation8 + $0x98] sm:$0xff] (!%p2406_p12) }
 0x142   : > { %1690 = vmatpush1.bf16.msra.mxu0 %v2968_v0  ;;  %1609 = vmatprep.subr.bf16.mxu1 %v2973_v1  ;;  %v1753_v0 = vld [vmem:[#allocation8 + $0x10] sm:$0xff] (!%p2406_p12)  ;;  %v1754_v1 = vld [vmem:[#allocation8 + $0x18] sm:$0xff] (!%p2406_p12) }
 0x143   : > { %1691 = vmatprep.subr.bf16.mxu0 %v2976_v2  ;;  %v2523_v2 = vpack.c.bf16 (!%p2406_p12), %v1770_v63, %v1769_v60 }
 0x145   : > { %1610 = vmatpush1.bf16.msra.mxu1 %v2971_v3  ;;  %v2525_v3 = vpack.c.bf16 (!%p2406_p12), %v1754_v1, %v1753_v0  ;;  %v1763_v1 = vld [vmem:[#allocation8 + $0x60] sm:$0xff] (!%p2406_p12) }
 0x146   : > { %1692 = vmatpush1.bf16.msra.mxu0 %v2974_v4  ;;  %1611 = vmatprep.subr.bf16.mxu1 %v2979_v5  ;;  %v1801_v4 = vld [vmem:[#allocation8 + $0x190] sm:$0xff] (!%p2406_p12)  ;;  %v1802_v5 = vld [vmem:[#allocation8 + $0x198] sm:$0xff] (!%p2406_p12) }
 0x147   : > { %1693 = vmatprep.subr.bf16.mxu0 %v2982_v6  ;;  %v1785_v6 = vld [vmem:[#allocation8 + $0x110] sm:$0xff] (!%p2406_p12) }
 0x149   : > { %1612 = vmatpush1.bf16.msra.mxu1 %v2977_v7  ;;  %v2555_v7 = vpack.c.bf16 (!%p2406_p12), %v1802_v5, %v1801_v4 }
 0x14a   : > { %1694 = vmatpush1.bf16.msra.mxu0 %v2980_v8  ;;  %1613 = vmatprep.subr.bf16.mxu1 %v2985_v9  ;;  %v1786_v8 = vld [vmem:[#allocation8 + $0x118] sm:$0xff] (!%p2406_p12)  ;;  %v1771_v9 = vld [vmem:[#allocation8 + $0xa0] sm:$0xff] (!%p2406_p12) }
 0x14b   : > { %1695 = vmatprep.subr.bf16.mxu0 %v2988_v11  ;;  %v1772_v11 = vld [vmem:[#allocation8 + $0xa8] sm:$0xff] (!%p2406_p12) }
 0x14d   : > { %1614 = vmatpush1.bf16.msra.mxu1 %v2983_v12  ;;  %v2557_v12 = vpack.c.bf16 (!%p2406_p12), %v1786_v8, %v1785_v6  ;;  %v2575_v6 = vpack.c.bf16 (!%p2406_p12), %v1812_v59, %v1811_v58  ;;  %v1781_v8 = vld [vmem:[#allocation8 + $0xf0] sm:$0xff] (!%p2406_p12) }
 0x14e   : > { %1696 = vmatpush1.bf16.msra.mxu0 %v2986_v13  ;;  %1615 = vmatprep.subr.bf16.mxu1 %v2991_v15  ;;  %v2527_v13 = vpack.c.bf16 (!%p2406_p12), %v1772_v11, %v1771_v9  ;;  %v1755_v15 = vld [vmem:[#allocation8 + $0x20] sm:$0xff] (!%p2406_p12)  ;;  %v1782_v9 = vld [vmem:[#allocation8 + $0xf8] sm:$0xff] (!%p2406_p12)  ;;  %v1813_v11 = vld [vmem:[#allocation8 + $0x1f0] sm:$0xff] (!%p2406_p12) }
 0x14f   : > { %1697 = vmatprep.subr.bf16.mxu0 %v2994_v16  ;;  %v1756_v16 = vld [vmem:[#allocation8 + $0x28] sm:$0xff] (!%p2406_p12)  ;;  %v1825_v59 = vld [vmem:[#allocation8 + $0x250] sm:$0xff] (!%p2406_p12) }
 0x151   : > { %1616 = vmatpush1.bf16.msra.mxu1 %v2989_v17  ;;  %v1803_v17 = vld [vmem:[#allocation8 + $0x1a0] sm:$0xff] (!%p2406_p12) }
 0x152   : > { %1698 = vmatpush1.bf16.msra.mxu0 %v2992_v18  ;;  %2552 = vmatprep.subr.bf16.mxu1 (!%p2406_p12), %v2551_v57  ;;  %v1804_v18 = vld [vmem:[#allocation8 + $0x1a8] sm:$0xff] (!%p2406_p12) }
 0x153   : > { %2520 = vmatprep.subr.bf16.mxu0 (!%p2406_p12), %v2519_v52  ;;  %v1762_v52 = vld [vmem:[#allocation8 + $0x58] sm:$0xff] (!%p2406_p12)  ;;  %v1780_v57 = vld [vmem:[#allocation8 + $0xe8] sm:$0xff] (!%p2406_p12) }
 0x154   : > { %1618 = vmatmul.mubr.bf16.vlgmr.msra.gmra.mrb[4].mxu1 %v3519_v14  ;;  %v2541_v60 = vpack.c.bf16 (!%p2406_p12), %v1762_v52, %v1761_v49  ;;  %v1839_v49 = vld [vmem:[#allocation8 + $0x2c0] sm:$0xff] (!%p2406_p12) }
 0x155   : > { %1700 = vmatmul.mubr.bf16.vlgmr.msra.gmra.mrb[4].mxu0 %v3519_v14  ;;  %2554 = vmatpush3.bf16.msra.mxu1 (!%p2406_p12), %v2553_v61  ;;  %v2573_v61 = vpack.c.bf16 (!%p2406_p12), %v1794_v54, %v1793_v53  ;;  %v1823_v53 = vld [vmem:[#allocation8 + $0x240] sm:$0xff] (!%p2406_p12)  ;;  %v1824_v54 = vld [vmem:[#allocation8 + $0x248] sm:$0xff] (!%p2406_p12) }
 0x156   : > { %2522 = vmatpush3.bf16.msra.mxu0 (!%p2406_p12), %v2521_v56  ;;  %2556 = vmatprep.subr.bf16.mxu1 (!%p2406_p12), %v2555_v7  ;;  %v1779_v56 = vld [vmem:[#allocation8 + $0xe0] sm:$0xff] (!%p2406_p12)  ;;  %v1796_v7 = vld [vmem:[#allocation8 + $0x168] sm:$0xff] (!%p2406_p12) }
 0x157   : > { %2524 = vmatprep.subr.bf16.mxu0 (!%p2406_p12), %v2523_v2  ;;  %v2543_v0 = vpack.c.bf16 (!%p2406_p12), %v1780_v57, %v1779_v56  ;;  %v1764_v2 = vld [vmem:[#allocation8 + $0x68] sm:$0xff] (!%p2406_p12)  ;;  %v1842_v56 = vld [vmem:[#allocation8 + $0x2d8] sm:$0xff] (!%p2406_p12)  ;;  %v2601_v57 = vpack.c.bf16 (!%p2406_p12), %v1824_v54, %v1823_v53 }
 0x159   : > { %2558 = vmatpush3.bf16.msra.mxu1 (!%p2406_p12), %v2557_v12  ;;  %v1814_v12 = vld [vmem:[#allocation8 + $0x1f8] sm:$0xff] (!%p2406_p12) }
 0x15a   : > { %2526 = vmatpush3.bf16.msra.mxu0 (!%p2406_p12), %v2525_v3  ;;  %v1795_v3 = vld [vmem:[#allocation8 + $0x160] sm:$0xff] (!%p2406_p12) }
 0x15b   : > { %2528 = vmatprep.subr.bf16.mxu0 (!%p2406_p12), %v2527_v13 }
 0x1a7   : > { %v1496_v19 = vpop.f32.mrb[0].mxu1 }
 0x1a8   : > { %v1537_v20 = vpop.f32.mrb[0].mxu0  ;;  %v1498_v22 = vpop.f32.mrb[1].mxu1 }
 0x1a9   : > { %v1538_v21 = vadd.f32 %v1537_v20, %v1496_v19  ;;  %v1539_v23 = vpop.f32.mrb[1].mxu0  ;;  %v1500_v25 = vpop.f32.mrb[2].mxu1  ;;  %v1787_v19 = vld [vmem:[#allocation8 + $0x120] sm:$0xff] (!%p2406_p12)  ;;  %v1788_v20 = vld [vmem:[#allocation8 + $0x128] sm:$0xff] (!%p2406_p12) }
 0x1aa   : > { %v1540_v24 = vadd.f32 %v1539_v23, %v1498_v22  ;;  %v1541_v26 = vpop.f32.mrb[2].mxu0  ;;  %v1501_v10 = vpop.f32.mrb[3].mxu1  ;;  %v2559_v22 = vpack.c.bf16 (!%p2406_p12), %v1804_v18, %v1803_v17  ;;  %v1773_v23 = vld [vmem:[#allocation8 + $0xb0] sm:$0xff] (!%p2406_p12)  ;;  %v2577_v17 = vpack.c.bf16 (!%p2406_p12), %v1796_v7, %v1795_v3  ;;  %v2547_v18 = vpack.c.bf16 (!%p2406_p12), %v1782_v9, %v1781_v8  ;;  %v1828_v3 = vld [vmem:[#allocation8 + $0x268] sm:$0xff] (!%p2406_p12)  ;;  %v1830_v9 = vld [vmem:[#allocation8 + $0x278] sm:$0xff] (!%p2406_p12) }
 0x1ab   : > { %v1542_v27 = vpop.f32.mrb[3].mxu0  ;;  %v1757_v25 = vld [vmem:[#allocation8 + $0x30] sm:$0xff] (!%p2406_p12)  ;;  %v2561_v26 = vpack.c.bf16 (!%p2406_p12), %v1788_v20, %v1787_v19  ;;  %v1766_v20 = vld [vmem:[#allocation8 + $0x78] sm:$0xff] (!%p2406_p12) }
 0x1ac   : > { %v1714_v28 = vcombine.low %v1538_v21, %v1540_v24  ;;  %v2529_v21 = vpack.c.bf16 (!%p2406_p12), %v1756_v16, %v1755_v15  ;;  %v1774_v24 = vld [vmem:[#allocation8 + $0xb8] sm:$0xff] (!%p2406_p12)  ;;  %2560 = vmatprep.subr.bf16.mxu1 (!%p2406_p12), %v2559_v22  ;;  %v2545_v16 = vpack.c.bf16 (!%p2406_p12), %v1764_v2, %v1763_v1  ;;  %v1765_v19 = vld [vmem:[#allocation8 + $0x70] sm:$0xff] (!%p2406_p12)  ;;  %v1827_v2 = vld [vmem:[#allocation8 + $0x260] sm:$0xff] (!%p2406_p12) }
 0x1ad   : > { %v2531_v10 = vpack.c.bf16 (!%p2406_p12), %v1774_v24, %v1773_v23  ;;  %v1758_v27 = vld [vmem:[#allocation8 + $0x38] sm:$0xff] (!%p2406_p12)  ;;  %2562 = vmatpush3.bf16.msra.mxu1 (!%p2406_p12), %v2561_v26  ;;  %v2579_v23 = vpack.c.bf16 (!%p2406_p12), %v1814_v12, %v1813_v11  ;;  %v1832_v26 = vld [vmem:[#allocation8 + $0x288] sm:$0xff] (!%p2406_p12)  ;;  %v1829_v8 = vld [vmem:[#allocation8 + $0x270] sm:$0xff] (!%p2406_p12) }
 0x1ae   : > { %v1722_v42 = vrot.slane %v1714_v28, %v3656_v62  ;;  %v1805_v28 = vld [vmem:[#allocation8 + $0x1b0] sm:$0xff] (!%p2406_p12)  ;;  %2530 = vmatpush3.bf16.msra.mxu0 (!%p2406_p12), %v2529_v21  ;;  %v1798_v24 = vld [vmem:[#allocation8 + $0x178] sm:$0xff] (!%p2406_p12)  ;;  %v2613_v11 = vpack.c.bf16 (!%p2406_p12), %v1830_v9, %v1829_v8 }
 0x1af   : > { %v2563_v30 = vpack.c.bf16 (!%p2406_p12), %v1806_v29, %v1805_v28  ;;  %2532 = vmatprep.subr.bf16.mxu0 (!%p2406_p12), %v2531_v10  ;;  %v1797_v21 = vld [vmem:[#allocation8 + $0x170] sm:$0xff] (!%p2406_p12)  ;;  %v2549_v10 = vpack.c.bf16 (!%p2406_p12), %v1766_v20, %v1765_v19  ;;  %v1815_v28 = vld [vmem:[#allocation8 + $0x200] sm:$0xff] (!%p2406_p12)  ;;  %v1816_v29 = vld [vmem:[#allocation8 + $0x208] sm:$0xff] (!%p2406_p12) }
 0x1b1   : > { %2564 = vmatprep.subr.bf16.mxu1 (!%p2406_p12), %v2563_v30  ;;  %v1833_v30 = vld [vmem:[#allocation8 + $0x290] sm:$0xff] (!%p2406_p12) }
 0x227   : > { %v1619_v32 = vpop.f32.mrb[4].mxu1 }
 0x228   : > { %v1701_v33 = vpop.f32.mrb[4].mxu0  ;;  %v1621_v14 = vpop.f32.mrb[5].mxu1 }
 0x229   : > { %v1703_v34 = vpop.f32.mrb[5].mxu0  ;;  %v1715_v35 = vcombine.low %v1619_v32, %v1621_v14  ;;  %v1623_v37 = vpop.f32.mrb[6].mxu1  ;;  %v1790_v32 = vld [vmem:[#allocation8 + $0x138] sm:$0xff] (!%p2406_p12)  ;;  %v1776_v14 = vld [vmem:[#allocation8 + $0xc8] sm:$0xff] (!%p2406_p12) }
 0x22a   : > { %v1731_v36 = vcombine.low %v1701_v33, %v1703_v34  ;;  %v1705_v38 = vpop.f32.mrb[6].mxu0  ;;  %v1624_v40 = vpop.f32.mrb[7].mxu1  ;;  %v1775_v33 = vld [vmem:[#allocation8 + $0xc0] sm:$0xff] (!%p2406_p12)  ;;  %v2533_v34 = vpack.c.bf16 (!%p2406_p12), %v1758_v27, %v1757_v25  ;;  %v2565_v37 = vpack.c.bf16 (!%p2406_p12), %v1790_v32, %v1789_v31  ;;  %v1834_v31 = vld [vmem:[#allocation8 + $0x298] sm:$0xff] (!%p2406_p12)  ;;  %v2585_v32 = vpack.c.bf16 (!%p2406_p12), %v1816_v29, %v1815_v28 }
 0x22b   : > { %v1706_v41 = vpop.f32.mrb[7].mxu0  ;;  %v1729_v43 = vrot.slane %v1715_v35, %v3656_v62  ;;  %1748 = sbr.rel (%p2406_p12) target bundleno = 828 (0x33c), region = 60  ;;  %v1807_v35 = vld [vmem:[#allocation8 + $0x1c0] sm:$0xff] (!%p2406_p12)  ;;  %v2535_v38 = vpack.c.bf16 (!%p2406_p12), %v1776_v14, %v1775_v33  ;;  %v1760_v40 = vld [vmem:[#allocation8 + $0x48] sm:$0xff] (!%p2406_p12)  ;;  %v2587_v14 = vpack.c.bf16 (!%p2406_p12), %v1834_v31, %v1833_v30 }
 0x22c   : > { %v1738_v44 = vrot.slane %v1731_v36, %v3656_v62  ;;  %v1808_v36 = vld [vmem:[#allocation8 + $0x1c8] sm:$0xff] (!%p2406_p12)  ;;  %v1791_v41 = vld [vmem:[#allocation8 + $0x140] sm:$0xff] (!%p2406_p12)  ;;  %2534 = vmatpush3.bf16.msra.mxu0 (!%p2406_p12), %v2533_v34  ;;  %2566 = vmatpush3.bf16.msra.mxu1 (!%p2406_p12), %v2565_v37  ;;  %v1817_v34 = vld [vmem:[#allocation8 + $0x210] sm:$0xff] (!%p2406_p12) }
 0x22d   : > { %v1730_v47 = vcombine.low %v1722_v42, %v1729_v43  ;;  %v2567_v42 = vpack.c.bf16 (!%p2406_p12), %v1808_v36, %v1807_v35  ;;  %v1792_v43 = vld [vmem:[#allocation8 + $0x148] sm:$0xff] (!%p2406_p12)  ;;  %2536 = vmatprep.subr.bf16.mxu0 (!%p2406_p12), %v2535_v38  ;;  %v1831_v25 = vld [vmem:[#allocation8 + $0x280] sm:$0xff] (!%p2406_p12)  ;;  %v1818_v35 = vld [vmem:[#allocation8 + $0x218] sm:$0xff] (!%p2406_p12) }
 0x22e   : > { %v1742_v46 = vadd.f32 %v1738_v44, %v279_v39  ;;  %v1759_v39 = vld [vmem:[#allocation8 + $0x40] sm:$0xff] (!%p2406_p12)  ;;  %v1777_v44 = vld [vmem:[#allocation8 + $0xd0] sm:$0xff] (!%p2406_p12)  ;;  %v2569_v50 = vpack.c.bf16 (!%p2406_p12), %v1792_v43, %v1791_v41  ;;  %v2583_v27 = vpack.c.bf16 (!%p2406_p12), %v1832_v26, %v1831_v25  ;;  %v1836_v38 = vld [vmem:[#allocation8 + $0x2a8] sm:$0xff] (!%p2406_p12) }
 0x22f   : > { %v1741_v48 = vadd.f32 %v1730_v47, %v278_v45  ;;  %v1778_v45 = vld [vmem:[#allocation8 + $0xd8] sm:$0xff] (!%p2406_p12)  ;;  %v1809_v47 = vld [vmem:[#allocation8 + $0x1d0] sm:$0xff] (!%p2406_p12)  ;;  %2568 = vmatprep.subr.bf16.mxu1 (!%p2406_p12), %v2567_v42  ;;  %v1835_v37 = vld [vmem:[#allocation8 + $0x2a0] sm:$0xff] (!%p2406_p12) }
 0x230   : > { %1744 = vst [vmem:[#allocation2 + $0x8] sm:$0xf] %v1742_v46  ;;  %v1810_v46 = vld [vmem:[#allocation8 + $0x1d8] sm:$0xff] (!%p2406_p12)  ;;  %v2539_v51 = vpack.c.bf16 (!%p2406_p12), %v1778_v45, %v1777_v44  ;;  %2570 = vmatpush3.bf16.msra.mxu1 (!%p2406_p12), %v2569_v50  ;;  %v1819_v41 = vld [vmem:[#allocation8 + $0x220] sm:$0xff] (!%p2406_p12)  ;;  %v1820_v42 = vld [vmem:[#allocation8 + $0x228] sm:$0xff] (!%p2406_p12) }
 0x231   : > { %1743 = vst [vmem:[#allocation2] sm:$0xff] %v1741_v48  ;;  %v2537_v48 = vpack.c.bf16 (!%p2406_p12), %v1760_v40, %v1759_v39  ;;  %v2571_v55 = vpack.c.bf16 (!%p2406_p12), %v1810_v46, %v1809_v47  ;;  %v2589_v39 = vpack.c.bf16 (!%p2406_p12), %v1818_v35, %v1817_v34  ;;  %v2591_v40 = vpack.c.bf16 (!%p2406_p12), %v1836_v38, %v1835_v37  ;;  %v1837_v43 = vld [vmem:[#allocation8 + $0x2b0] sm:$0xff] (!%p2406_p12)  ;;  %v1838_v44 = vld [vmem:[#allocation8 + $0x2b8] sm:$0xff] (!%p2406_p12)  ;;  %v1840_v50 = vld [vmem:[#allocation8 + $0x2c8] sm:$0xff] (!%p2406_p12) }
 0x232   : > { %v2593_v45 = vpack.c.bf16 %v1820_v42, %v1819_v41  ;;  %v2595_v47 = vpack.c.bf16 %v1838_v44, %v1837_v43  ;;  %v1821_v46 = vld [vmem:[#allocation8 + $0x230] sm:$0xff]  ;;  %v2599_v52 = vpack.c.bf16 %v1840_v50, %v1839_v49 }
 0x233   : > { %2538 = vmatpush3.bf16.msra.mxu0 %v2537_v48  ;;  %2572 = vmatprep.subr.bf16.mxu1 %v2571_v55  ;;  %v1822_v48 = vld [vmem:[#allocation8 + $0x238] sm:$0xff]  ;;  %v1841_v55 = vld [vmem:[#allocation8 + $0x2d0] sm:$0xff] }
 0x234   : > { %2540 = vmatprep.subr.bf16.mxu0 %v2539_v51  ;;  %2574 = vmatpush3.bf16.msra.mxu1 %v2573_v61  ;;  %v2597_v51 = vpack.c.bf16 %v1822_v48, %v1821_v46  ;;  %v2603_v58 = vpack.c.bf16 %v1842_v56, %v1841_v55  ;;  %v1843_v61 = vld [vmem:[#allocation8 + $0x2e0] sm:$0xff] }
 0x235   : > { %2576 = vmatprep.subr.bf16.mxu1 %v2575_v6  ;;  %v2609_v6 = vpack.c.bf16 %v1828_v3, %v1827_v2 }
 0x237   : > { %2542 = vmatpush3.bf16.msra.mxu0 %v2541_v60  ;;  %v2408_v33 = vld.sshfl [vmem:[#allocation2 + $0x8] sm:$0x33 pattern:$0x76325410]  ;;  %v1826_v60 = vld [vmem:[#allocation8 + $0x258] sm:$0xff] }
 0x238   : > { %v1749_v63 = vld [vmem:[#allocation2] sm:$0xff]  ;;  %2544 = vmatprep.subr.bf16.mxu0 %v2543_v0  ;;  %2578 = vmatpush3.bf16.msra.mxu1 %v2577_v17  ;;  %v1880_v36 = vcombine.high %v2408_v33, %v2408_v33  ;;  %v2605_v0 = vpack.c.bf16 %v1826_v60, %v1825_v59 }
 0x239   : > { %v1863_v4 = vrot.slane %v1749_v63, %v3656_v62  ;;  %v1856_v5 = vcombine.high %v1749_v63, %v1749_v63  ;;  %2580 = vmatprep.subr.bf16.mxu1 %v2579_v23  ;;  %v1844_v63 = vld [vmem:[#allocation8 + $0x2e8] sm:$0xff] }
 0x23a   : > { %v2607_v1 = vpack.c.bf16 %v1844_v63, %v1843_v61 }
 0x23b   : > { %v1871_v13 = vcombine.high %v1863_v4, %v1863_v4  ;;  %v1870_v15 = vrot.slane %v1856_v5, %v3656_v62  ;;  %2546 = vmatpush3.bf16.msra.mxu0 %v2545_v16  ;;  %v2581_v62 = vpack.c.bf16 %v1798_v24, %v1797_v21  ;;  %v1846_v5 = vld [vmem:[#allocation8 + $0x2f8] sm:$0xff] }
 0x23c   : > { %2548 = vmatprep.subr.bf16.mxu0 %v2547_v18 }
 0x23d   : > { %v1872_v22 = vcombine.high %v1870_v15, %v1870_v15  ;;  %1951 = vmatprep.mubr.f32.mxu0 %v1871_v13  ;;  %2582 = vmatpush3.bf16.msra.mxu1 %v2581_v62  ;;  %v2407_v13 = vld [vmem:[#allocation9] ss:$0 sm:$0xff] }
 0x23f   : > { %2021 = vmatprep.mubr.f32.mxu1 %v1872_v22  ;;  %2550 = vmatpush3.bf16.msra.mxu0 %v2549_v10 }
 0x240   : > { %2584 = vmatprep.subr.bf16.mxu0 %v2583_v27  ;;  %2022 = vmatmul.mubr.f32.vlgmr.msra.gmra.mrb[0].mxu1 %v1870_v15 }
 0x242   : > { %1952 = vmatmul.mubr.f32.vlgmr.msra.gmra.mrb[0].mxu0 %v1863_v4  ;;  %v1845_v4 = vld [vmem:[#allocation8 + $0x2f0] sm:$0xff] }
 0x243   : > { %2586 = vmatpush3.bf16.msra.mxu0 %v2585_v32  ;;  %2091 = vmatprep.mubr.f32.mxu0 %v1880_v36  ;;  %v2611_v7 = vpack.c.bf16 %v1846_v5, %v1845_v4 }
 0x244   : > { %2588 = vmatprep.subr.bf16.mxu0 %v2587_v14 }
 0x247   : > { %2590 = vmatpush3.bf16.msra.mxu0 %v2589_v39 }
 0x248   : > { %2592 = vmatprep.subr.bf16.mxu0 %v2591_v40 }
 0x24b   : > { %2594 = vmatpush3.bf16.msra.mxu0 %v2593_v45 }
 0x24c   : > { %2596 = vmatprep.subr.bf16.mxu0 %v2595_v47 }
 0x24f   : > { %2598 = vmatpush3.bf16.msra.mxu0 %v2597_v51 }
 0x250   : > { %2600 = vmatprep.subr.bf16.mxu0 %v2599_v52 }
 0x253   : > { %2602 = vmatpush3.bf16.msra.mxu0 %v2601_v57 }
 0x254   : > { %2604 = vmatprep.subr.bf16.mxu0 %v2603_v58 }
 0x257   : > { %2606 = vmatpush3.bf16.msra.mxu0 %v2605_v0 }
 0x258   : > { %2608 = vmatprep.subr.bf16.mxu0 %v2607_v1 }
 0x25b   : > { %2610 = vmatpush3.bf16.msra.mxu0 %v2609_v6 }
 0x25c   : > { %2612 = vmatprep.subr.bf16.mxu0 %v2611_v7 }
 0x25f   : > { %2614 = vmatpush3.bf16.msra.mxu0 %v2613_v11 }
 0x262   : > { %2092 = vmatmul.mubr.f32.vlgmr.msra.gmra.mrb[2].mxu0 %v2408_v33 }
 0x313   : > { %v2481_v16 = vpop.f32.mrb[0].mxu1 }
 0x314   : > { %v2482_v18 = vpop.f32.mrb[1].mxu1 }
 0x315   : > { %v2446_v12 = vpop.f32.mrb[0].mxu0  ;;  %v2483_v19 = vadd.f32 %v2482_v18, %v2481_v16 }
 0x316   : > { %v2447_v15 = vpop.f32.mrb[1].mxu0 }
 0x317   : > { %v2448_v17 = vadd.f32 %v2447_v15, %v2446_v12 }
 0x319   : > { %v1954_v20 = vadd.f32 %v2448_v17, %v2407_v13 }
 0x31b   : > { %v2024_v21 = vadd.f32 %v2483_v19, %v1954_v20 }
 0x335   : > { %v2516_v22 = vpop.f32.mrb[2].mxu0 }
 0x336   : > { %v2517_v23 = vpop.f32.mrb[3].mxu0 }
 0x337   : > { %v2518_v24 = vadd.f32 %v2517_v23, %v2516_v22 }
 0x339   : > { %v2094_v25 = vadd.f32 %v2518_v24, %v2024_v21 }
 0x33b   : > { %2097 = vst [vmem:[#allocation11] sm:$0x3] %v2094_v25 }
 0x33c PF: > { %p2663_p0 = scmp.eq.s32.totalorder %s3246_s19, 1  ;;  %s3201_s20 = smov [#allocation11]  }
 0x33d   : > { %s2105_s21 = sshll.u32 %s3201_s20, 4  ;;  %s2106_s21 = int_to_ptr.vmem [resolvable:$true] %s2105_s21 }
 0x33e   : > { %s3112_s24 = scalar_lea.vmem %s2106_s21, 32  ;;  %p3119_p10 = scmp.lt.s32.totalorder %s2106_s21, %s2106_s21 }
 0x33f   : > { %p3113_p2 = scmp.ne.s32.totalorder %s2106_s21, %s3112_s24  ;;  %p3120_p9 = scmp.lt.s32.totalorder %s3112_s24, %s3112_s24 }
 0x341   : > { %p3114_p13 = pnand %p3113_p2, %p2663_p0  ;;  %p3121_p11 = por %p3120_p9, %p3119_p10 }
 0x343   : > { %p3115_p3 = pneg %p3114_p13 }
 0x345   : > { %p3122_p7 = pnand %p3121_p11, %p3115_p3 }
 0x347   : > { %3125 = shalt.err (!%p3122_p7)
}
 0x348   : > { %s3126_s25 = scalar_lea.hbm %s3704_s4, 32 }
 0x349   : > { %p3127_p8 = scmp.ne.s32.totalorder %s3704_s4, %s3126_s25  ;;  %p3132_p5 = scmp.lt.u32.totalorder %s3126_s25, %s3704_s4 }
 0x34b   : > { %p3128_p1 = pnand %p3127_p8, %p2663_p0 }
 0x34d   : > { %p3129_p4 = pneg %p3128_p1 }
 0x34f   : > { %p3134_p6 = pnand %p3132_p5, %p3129_p4 }
 0x351   : > { %3137 = shalt.err (!%p3134_p6)
}
 0x352   : > { %2641 = dma.vmem_to_hbm [thread:$0]  (%p2663_p0), %s2106_s21, 32, %s3704_s4, [#allocation5]  }
 0x353   : > { %3171 = dma.done.wait (%p2663_p0), [#allocation5], 32  }
 0x354   : > { %3173 = vsyncadd (%p2663_p0), [#allocation5], 4294967264 }
 0x355 PF: > { %p19_p12 = scmp.ge.s32.totalorder %s3322_s6, 4   ;;  %s3719_s15 = smov %s3180_s16 }
 0x356   : > { %s3720_s16 = smov %s3184_s17  ;;  %s3721_s17 = smov %s3335_s9 }
 0x357   : > { %s3722_s18 = smov %s3322_s6  ;;  %21 = sbr.rel (!%p19_p12) target bundleno = 7 (0x7), region = 102 }
 0x35e   :  { %2118 = vsyncpa [#allocation4], 1 }
 0x35f   :  { %2120 = vsyncpa [#allocation4 + $0x1], 1 }
 0x360   :  { %2121 = vsyncpa [#allocation7], 1 }
 0x361   :  { %2123 = vsyncpa [#allocation7 + $0x1], 1 }
 0x362   :  { %2124 = vsyncpa [#allocation10], 1 }
 0x363   :  { %2125 = vsyncpa [#allocation5], 1 }
 0x364   :  { %2127 = vsyncpa [#allocation5 + $0x1], 1 }

</bundles_post_ra>
